<compile_context>
chip_gen: v7x
topology: tpu7x:2x2x1
jax: 0.10.0
libtpu: 0.0.40
codegen_flags: <defaults>
</compile_context>

<pallas_src>
import math
from functools import partial

import jax
import jax.numpy as jnp
from jax import lax
from jax.experimental import pallas as pl
from jax.experimental.pallas import tpu as pltpu


# ----------------------------- kernel helpers ------------------------------

def _layernorm(x, gamma, beta, eps=1e-5):
    mu = jnp.mean(x, axis=-1, keepdims=True)
    var = jnp.mean((x - mu) ** 2, axis=-1, keepdims=True)
    return (x - mu) * lax.rsqrt(var + eps) * gamma + beta


# ------------------------------ fused kernel --------------------------------

def fused_forward_kernel(feats_ref, mask_ref, add_ref, kbias_ref,
                         projw_ref, projb_ref,
                         wq_ref, wk_ref, wv_ref, bq_ref, bk_ref, bv_ref,
                         wo_ref, bo_ref,
                         ln1w_ref, ln1b_ref, ln2w_ref, ln2b_ref,
                         w1_ref, b1_ref, w2_ref, b2_ref,
                         outw_ref, outb_ref,
                         emb_ref, out_ref,
                         *, nhead, num_layers, batch, s_pad):
    """Entire StarterBERT forward for one batch block, resident in VMEM."""
    H = add_ref.shape[1]
    dh = H // nhead
    BS = batch * s_pad
    scale = 1.0 / math.sqrt(dh)

    # ---- EventEncoder output projection; mask zeroes pad rows + starter slot;
    #      starter + trainable PE come in as one precomputed additive table. ----
    emb = jnp.dot(feats_ref[...], projw_ref[...],
                  preferred_element_type=jnp.float32) + projb_ref[...]
    x = emb * mask_ref[...] + add_ref[...]                       # (BS, H) f32

    kbias = kbias_ref[...]                                       # (1, S_pad): 0 / -1e9

    # ---- one pre-LN encoder layer (dynamic layer index into stacked weights) ----
    def layer_body(l, x):
        # -- self-attention block (pre-LN) --
        h = _layernorm(x, ln1w_ref[l], ln1b_ref[l]).astype(jnp.bfloat16)
        wq = wq_ref[l]; wk = wk_ref[l]; wv = wv_ref[l]           # (nhead, H, dh) bf16
        bq = bq_ref[l]; bk = bk_ref[l]; bv = bv_ref[l]           # (nhead, dh) f32
        heads = []
        for hi in range(nhead):                                  # nhead is small & static
            q = (jnp.dot(h, wq[hi], preferred_element_type=jnp.float32)
                 + bq[hi:hi + 1, :]).astype(jnp.bfloat16)
            k = (jnp.dot(h, wk[hi], preferred_element_type=jnp.float32)
                 + bk[hi:hi + 1, :]).astype(jnp.bfloat16)
            v = (jnp.dot(h, wv[hi], preferred_element_type=jnp.float32)
                 + bv[hi:hi + 1, :]).astype(jnp.bfloat16)
            q3 = q.reshape(batch, s_pad, dh)
            k3 = k.reshape(batch, s_pad, dh)
            v3 = v.reshape(batch, s_pad, dh)
            s = jnp.einsum('bqd,bkd->bqk', q3, k3,
                           preferred_element_type=jnp.float32) * scale
            s = s + kbias[None]                                  # mask padded key rows
            s = s - jnp.max(s, axis=-1, keepdims=True)
            p = jnp.exp(s)
            p = p * pl.reciprocal(jnp.sum(p, axis=-1, keepdims=True), approx=True)
            oh = jnp.einsum('bqk,bkd->bqd', p.astype(jnp.bfloat16), v3,
                            preferred_element_type=jnp.float32)  # (B, S_pad, dh)
            heads.append(oh.reshape(BS, dh))
        # single K=H output projection over all heads (stacked head-major)
        o_all = jnp.concatenate(heads, axis=-1).astype(jnp.bfloat16)     # (BS, H)
        attn = jnp.dot(o_all, wo_ref[l],
                       preferred_element_type=jnp.float32) + bo_ref[l]
        x = x + attn
        # -- feed-forward block (pre-LN) --
        h2 = _layernorm(x, ln2w_ref[l], ln2b_ref[l]).astype(jnp.bfloat16)
        ff = jnp.dot(h2, w1_ref[l], preferred_element_type=jnp.float32) + b1_ref[l]
        ff = jnp.maximum(ff, 0.0).astype(jnp.bfloat16)           # ReLU
        ff = jnp.dot(ff, w2_ref[l], preferred_element_type=jnp.float32) + b2_ref[l]
        return x + ff

    # shared=False: the L-layer stack is applied num_layers times -> L**2 layer apps
    def rep_body(_, x):
        return lax.fori_loop(0, num_layers, layer_body, x)

    x = lax.fori_loop(0, num_layers, rep_body, x)

    # ---- head: starter-token embedding + output Linear ----
    emb_rows = x.reshape(batch, s_pad, H)[:, 0, :]               # (batch, H)
    emb_ref[...] = emb_rows
    out_ref[...] = (jnp.dot(emb_rows.astype(jnp.bfloat16), outw_ref[...],
                            preferred_element_type=jnp.float32) + outb_ref[...])


# ------------------------- model params + forward ---------------------------

def init_params(key, *, vocab_sizes, n_cont, encoder_hidden_dim, hidden_dim,
                dim_feedforward, output_dim, num_layers, max_len):
    eh, H, dff, O = encoder_hidden_dim, hidden_dim, dim_feedforward, output_dim
    n_cat = len(vocab_sizes)
    F = (n_cat + n_cont) * eh
    keys = iter(jax.random.split(key, 64))
    nrm = lambda shape, s=0.02: (s * jax.random.normal(next(keys), shape)).astype(jnp.float32)

    params = {
        "cat_emb": [nrm((v, eh)) for v in vocab_sizes],
        "cont_w": nrm((n_cont, eh)),
        "cont_b": nrm((n_cont, eh)),
        "proj_w": nrm((F, H)),
        "proj_b": jnp.zeros((1, H), jnp.float32),
        "starter": jax.random.normal(next(keys), (1, 1, H)).astype(jnp.float32),  # starter='randn'
        "pe": nrm((max_len + 1, H)),   # TrainablePositionalEncoding table
        "out_w": nrm((H, O)),
        "out_b": jnp.zeros((1, O), jnp.float32),
        "layers": [],
    }
    for _ in range(num_layers):
        params["layers"].append({
            "wqkv": nrm((H, 3 * H)), "bqkv": jnp.zeros((1, 3 * H), jnp.float32),
            "wo": nrm((H, H)), "bo": jnp.zeros((1, H), jnp.float32),
            "ln1w": jnp.ones((1, H), jnp.float32), "ln1b": jnp.zeros((1, H), jnp.float32),
            "ln2w": jnp.ones((1, H), jnp.float32), "ln2b": jnp.zeros((1, H), jnp.float32),
            "w1": nrm((H, dff)), "b1": jnp.zeros((1, dff), jnp.float32),
            "w2": nrm((dff, H)), "b2": jnp.zeros((1, H), jnp.float32),
        })
    return params


def starter_bert_forward(cat_features, cont_features, attention_mask, params,
                         *, nhead, num_layers):
    B, T, _ = cat_features.shape
    H = params["proj_w"].shape[1]
    O = params["out_w"].shape[1]
    L = num_layers
    dh = H // nhead

    # ---- EventEncoder gathers / per-feature affine (XLA); projection is in-kernel ----
    pieces = []
    for i, tbl in enumerate(params["cat_emb"]):
        pieces.append(jnp.take(tbl, cat_features[:, :, i], axis=0))          # (B, T, eh)
    for j in range(cont_features.shape[-1]):
        pieces.append(cont_features[:, :, j:j + 1]
                      * params["cont_w"][j][None, None, :]
                      + params["cont_b"][j][None, None, :])                  # (B, T, eh)
    feats = jnp.concatenate(pieces, axis=-1).astype(jnp.float32)             # (B, T, F)
    Fdim = feats.shape[-1]

    S = T + 1
    S_pad = ((S + 7) // 8) * 8                                               # tile-aligned rows

    # Pre-pad events into the (B, S_pad) sequence layout: row 0 = starter slot,
    # rows >= S = padding. No per-row concat happens inside the kernel.
    feats_pad = jnp.zeros((B, S_pad, Fdim), jnp.float32).at[:, 1:S, :].set(feats)
    feats_pad = feats_pad.reshape(B * S_pad, Fdim).astype(jnp.bfloat16)
    mask_pad = jnp.zeros((B, S_pad, 1), jnp.float32).at[:, 1:S, :].set(
        attention_mask.astype(jnp.float32)[..., None])
    mask_pad = mask_pad.reshape(B * S_pad, 1)

    # Additive table = starter (row 0) + trainable PE (rows 0..S-1), zeros on pad rows.
    add_tbl = jnp.zeros((S_pad, H), jnp.float32).at[:S].set(params["pe"][:S])
    add_tbl = add_tbl.at[0].add(params["starter"][0, 0])
    add_full = jnp.tile(add_tbl[None], (B, 1, 1)).reshape(B * S_pad, H)

    kbias = jnp.where(jnp.arange(S_pad)[None, :] < S, 0.0, -1e9).astype(jnp.float32)

    # ---- stack per-layer weights to [L, ...]; head-leading QKV layout; bf16 operands ----
    stack = lambda name: jnp.stack([lyr[name] for lyr in params["layers"]], axis=0)
    wqkv = stack("wqkv")                                   # (L, H, 3H)
    bqkv = stack("bqkv")[:, 0, :]                          # (L, 3H)

    def head_major(w):                                     # (L, H, H) -> (L, nhead, H, dh)
        return w.reshape(L, H, nhead, dh).transpose(0, 2, 1, 3)

    wq = head_major(wqkv[:, :, 0 * H:1 * H]).astype(jnp.bfloat16)
    wk = head_major(wqkv[:, :, 1 * H:2 * H]).astype(jnp.bfloat16)
    wv = head_major(wqkv[:, :, 2 * H:3 * H]).astype(jnp.bfloat16)
    bq = bqkv[:, 0 * H:1 * H].reshape(L, nhead, dh)
    bk = bqkv[:, 1 * H:2 * H].reshape(L, nhead, dh)
    bv = bqkv[:, 2 * H:3 * H].reshape(L, nhead, dh)
    wo = stack("wo").astype(jnp.bfloat16)
    bo = stack("bo")
    ln1w, ln1b = stack("ln1w"), stack("ln1b")
    ln2w, ln2b = stack("ln2w"), stack("ln2b")
    w1 = stack("w1").astype(jnp.bfloat16)
    b1 = stack("b1")
    w2 = stack("w2").astype(jnp.bfloat16)
    b2 = stack("b2")
    proj_w = params["proj_w"].astype(jnp.bfloat16)
    proj_b = params["proj_b"]
    out_w = params["out_w"].astype(jnp.bfloat16)
    out_b = params["out_b"]
    dff = w1.shape[-1]

    # v7x megacore: split the batch across the grid only when blocks stay (8,128)-legal.
    bb = B // 2 if (B % 2 == 0 and (B // 2) % 8 == 0) else B
    grid_steps = B // bb

    weight_inputs = [kbias, proj_w, proj_b, wq, wk, wv, bq, bk, bv, wo, bo,
                     ln1w, ln1b, ln2w, ln2b, w1, b1, w2, b2, out_w, out_b]

    def weight_spec(a):
        nd = a.ndim
        kwargs = {}
        if grid_steps > 1:
            # constant index_map: single-buffer the resident weights (halves VMEM)
            kwargs["pipeline_mode"] = pl.Buffered(1)
        return pl.BlockSpec(a.shape, lambda i, _nd=nd: (0,) * _nd, **kwargs)

    in_specs = ([pl.BlockSpec((bb * S_pad, Fdim), lambda i: (i, 0)),
                 pl.BlockSpec((bb * S_pad, 1), lambda i: (i, 0)),
                 pl.BlockSpec((bb * S_pad, H), lambda i: (i, 0))]
                + [weight_spec(a) for a in weight_inputs])
    out_specs = (pl.BlockSpec((bb, H), lambda i: (i, 0)),
                 pl.BlockSpec((bb, O), lambda i: (i, 0)))

    # VMEM budget sized from the actual footprint (v5e scoped default is only 16 MiB;
    # keep under v7x's 64 MiB physical).
    def nbytes(a):
        return int(a.size) * a.dtype.itemsize
    in_bytes = (sum(nbytes(a) for a in weight_inputs)
                + (nbytes(feats_pad) + nbytes(mask_pad) + nbytes(add_full)) // grid_steps)
    act_bytes = bb * S_pad * (8 * H + 2 * dff + nhead * S_pad) * 4
    vmem_limit = int(min(56 * 2**20,
                         max(16 * 2**20, 2 * in_bytes + 4 * act_bytes + (2 << 20))))

    kernel = partial(fused_forward_kernel, nhead=nhead, num_layers=num_layers,
                     batch=bb, s_pad=S_pad)

    emb, out = pl.pallas_call(
        kernel,
        grid=(grid_steps,),
        out_shape=(jax.ShapeDtypeStruct((B, H), jnp.float32),
                   jax.ShapeDtypeStruct((B, O), jnp.float32)),
        in_specs=in_specs,
        out_specs=out_specs,
        compiler_params=pltpu.CompilerParams(
            dimension_semantics=("parallel",),
            vmem_limit_bytes=vmem_limit),
    )(feats_pad, mask_pad, add_full, *weight_inputs)
    return emb, out


# --------------------------------- main --------------------------------------

if __name__ == "__main__":
    # Small synthetic config
    B, T = 2, 8
    vocab_sizes = [5, 7]          # 2 categorical features
    n_cont = 3                    # 3 continuous features
    encoder_hidden_dim = 16
    hidden_dim = 32
    dim_feedforward = 64
    output_dim = 8
    num_layers = 2
    nhead = 4
    max_len = 64

    root = jax.random.PRNGKey(0)
    k_params, k_cat, k_cont, k_mask = jax.random.split(root, 4)

    params = init_params(k_params,
                         vocab_sizes=vocab_sizes, n_cont=n_cont,
                         encoder_hidden_dim=encoder_hidden_dim,
                         hidden_dim=hidden_dim, dim_feedforward=dim_feedforward,
                         output_dim=output_dim, num_layers=num_layers,
                         max_len=max_len)

    cat_features = jnp.stack(
        [jax.random.randint(jax.random.fold_in(k_cat, i), (B, T), 0, v)
         for i, v in enumerate(vocab_sizes)], axis=-1).astype(jnp.int32)      # (B, T, 2)
    cont_features = jax.random.normal(k_cont, (B, T, n_cont), jnp.float32)    # (B, T, 3)
    attention_mask = (jax.random.uniform(k_mask, (B, T)) > 0.2).astype(jnp.int32)  # (B, T)

    embedding, out = starter_bert_forward(cat_features, cont_features, attention_mask,
                                          params, nhead=nhead, num_layers=num_layers)
    jax.block_until_ready((embedding, out))

    assert embedding.shape == (B, hidden_dim)
    assert out.shape == (B, output_dim)
    assert bool(jnp.all(jnp.isfinite(embedding))) and bool(jnp.all(jnp.isfinite(out)))
    print("KERNEL_OK")
</pallas_src>

<mosaic_0001>
module attributes {stable_mosaic.version = 11 : i64} {
  func.func @fused_forward_kernel(%arg0: i32, %arg1: memref<32x80xbf16, #tpu.memory_space<vmem>>, %arg2: memref<32x1xf32, #tpu.memory_space<vmem>>, %arg3: memref<32x32xf32, #tpu.memory_space<vmem>>, %arg4: memref<1x16xf32, #tpu.memory_space<vmem>>, %arg5: memref<80x32xbf16, #tpu.memory_space<vmem>>, %arg6: memref<1x32xf32, #tpu.memory_space<vmem>>, %arg7: memref<2x4x32x8xbf16, #tpu.memory_space<vmem>>, %arg8: memref<2x4x32x8xbf16, #tpu.memory_space<vmem>>, %arg9: memref<2x4x32x8xbf16, #tpu.memory_space<vmem>>, %arg10: memref<2x4x8xf32, #tpu.memory_space<vmem>>, %arg11: memref<2x4x8xf32, #tpu.memory_space<vmem>>, %arg12: memref<2x4x8xf32, #tpu.memory_space<vmem>>, %arg13: memref<2x32x32xbf16, #tpu.memory_space<vmem>>, %arg14: memref<2x1x32xf32, #tpu.memory_space<vmem>>, %arg15: memref<2x1x32xf32, #tpu.memory_space<vmem>>, %arg16: memref<2x1x32xf32, #tpu.memory_space<vmem>>, %arg17: memref<2x1x32xf32, #tpu.memory_space<vmem>>, %arg18: memref<2x1x32xf32, #tpu.memory_space<vmem>>, %arg19: memref<2x32x64xbf16, #tpu.memory_space<vmem>>, %arg20: memref<2x1x64xf32, #tpu.memory_space<vmem>>, %arg21: memref<2x64x32xbf16, #tpu.memory_space<vmem>>, %arg22: memref<2x1x32xf32, #tpu.memory_space<vmem>>, %arg23: memref<32x8xbf16, #tpu.memory_space<vmem>>, %arg24: memref<1x8xf32, #tpu.memory_space<vmem>>, %arg25: memref<2x32xf32, #tpu.memory_space<vmem>>, %arg26: memref<2x8xf32, #tpu.memory_space<vmem>>) attributes {dimension_semantics = [#tpu.dimension_semantics<parallel>], iteration_bounds = array<i64: 1>, scalar_prefetch = 0 : i64, scratch_operands = 0 : i64, tpu.core_type = #tpu.core_type<tc>, window_params = [{transform_indices = @transform_0, window_bounds = array<i64: 32, 80>}, {transform_indices = @transform_1, window_bounds = array<i64: 32, 1>}, {transform_indices = @transform_2, window_bounds = array<i64: 32, 32>}, {pipeline_mode = #tpu.pipeline_mode<synchronous>, transform_indices = @transform_3, window_bounds = array<i64: 1, 16>}, {pipeline_mode = #tpu.pipeline_mode<synchronous>, transform_indices = @transform_4, window_bounds = array<i64: 80, 32>}, {pipeline_mode = #tpu.pipeline_mode<synchronous>, transform_indices = @transform_5, window_bounds = array<i64: 1, 32>}, {pipeline_mode = #tpu.pipeline_mode<synchronous>, transform_indices = @transform_6, window_bounds = array<i64: 2, 4, 32, 8>}, {pipeline_mode = #tpu.pipeline_mode<synchronous>, transform_indices = @transform_7, window_bounds = array<i64: 2, 4, 32, 8>}, {pipeline_mode = #tpu.pipeline_mode<synchronous>, transform_indices = @transform_8, window_bounds = array<i64: 2, 4, 32, 8>}, {pipeline_mode = #tpu.pipeline_mode<synchronous>, transform_indices = @transform_9, window_bounds = array<i64: 2, 4, 8>}, {pipeline_mode = #tpu.pipeline_mode<synchronous>, transform_indices = @transform_10, window_bounds = array<i64: 2, 4, 8>}, {pipeline_mode = #tpu.pipeline_mode<synchronous>, transform_indices = @transform_11, window_bounds = array<i64: 2, 4, 8>}, {pipeline_mode = #tpu.pipeline_mode<synchronous>, transform_indices = @transform_12, window_bounds = array<i64: 2, 32, 32>}, {pipeline_mode = #tpu.pipeline_mode<synchronous>, transform_indices = @transform_13, window_bounds = array<i64: 2, 1, 32>}, {pipeline_mode = #tpu.pipeline_mode<synchronous>, transform_indices = @transform_14, window_bounds = array<i64: 2, 1, 32>}, {pipeline_mode = #tpu.pipeline_mode<synchronous>, transform_indices = @transform_15, window_bounds = array<i64: 2, 1, 32>}, {pipeline_mode = #tpu.pipeline_mode<synchronous>, transform_indices = @transform_16, window_bounds = array<i64: 2, 1, 32>}, {pipeline_mode = #tpu.pipeline_mode<synchronous>, transform_indices = @transform_17, window_bounds = array<i64: 2, 1, 32>}, {pipeline_mode = #tpu.pipeline_mode<synchronous>, transform_indices = @transform_18, window_bounds = array<i64: 2, 32, 64>}, {pipeline_mode = #tpu.pipeline_mode<synchronous>, transform_indices = @transform_19, window_bounds = array<i64: 2, 1, 64>}, {pipeline_mode = #tpu.pipeline_mode<synchronous>, transform_indices = @transform_20, window_bounds = array<i64: 2, 64, 32>}, {pipeline_mode = #tpu.pipeline_mode<synchronous>, transform_indices = @transform_21, window_bounds = array<i64: 2, 1, 32>}, {pipeline_mode = #tpu.pipeline_mode<synchronous>, transform_indices = @transform_22, window_bounds = array<i64: 32, 8>}, {pipeline_mode = #tpu.pipeline_mode<synchronous>, transform_indices = @transform_23, window_bounds = array<i64: 1, 8>}, {transform_indices = @transform_24, window_bounds = array<i64: 2, 32>}, {transform_indices = @transform_25, window_bounds = array<i64: 2, 8>}]} {
    %c0 = arith.constant 0 : index
    %c0_0 = arith.constant 0 : index
    %0 = vector.load %arg1[%c0, %c0_0] : memref<32x80xbf16, #tpu.memory_space<vmem>>, vector<32x80xbf16>
    %c0_1 = arith.constant 0 : index
    %c0_2 = arith.constant 0 : index
    %1 = vector.load %arg5[%c0_1, %c0_2] : memref<80x32xbf16, #tpu.memory_space<vmem>>, vector<80x32xbf16>
    %cst = arith.constant dense<0.000000e+00> : vector<32x32xf32>
    %2 = tpu.matmul %0, %1, %cst {dimension_numbers = #tpu.dot_dimension_numbers<[1], [0], [0], [1], [0, 0, 1, 1], [], []>} : vector<32x80xbf16>, vector<80x32xbf16>, vector<32x32xf32> -> vector<32x32xf32>
    %c0_3 = arith.constant 0 : index
    %c0_4 = arith.constant 0 : index
    %3 = vector.load %arg6[%c0_3, %c0_4] : memref<1x32xf32, #tpu.memory_space<vmem>>, vector<1x32xf32>
    %4 = vector.broadcast %3 : vector<1x32xf32> to vector<32x32xf32>
    %5 = arith.addf %2, %4 : vector<32x32xf32>
    %c0_5 = arith.constant 0 : index
    %c0_6 = arith.constant 0 : index
    %6 = vector.load %arg2[%c0_5, %c0_6] : memref<32x1xf32, #tpu.memory_space<vmem>>, vector<32x1xf32>
    %7 = vector.broadcast %6 : vector<32x1xf32> to vector<32x32xf32>
    %8 = arith.mulf %5, %7 : vector<32x32xf32>
    %c0_7 = arith.constant 0 : index
    %c0_8 = arith.constant 0 : index
    %9 = vector.load %arg3[%c0_7, %c0_8] : memref<32x32xf32, #tpu.memory_space<vmem>>, vector<32x32xf32>
    %10 = arith.addf %8, %9 : vector<32x32xf32>
    %c0_9 = arith.constant 0 : index
    %c0_10 = arith.constant 0 : index
    %11 = vector.load %arg4[%c0_9, %c0_10] : memref<1x16xf32, #tpu.memory_space<vmem>>, vector<1x16xf32>
    %c0_i32 = arith.constant 0 : i32
    %c2_i32 = arith.constant 2 : i32
    %12 = arith.addi %c0_i32, %c2_i32 : i32
    %c1_i32 = arith.constant 1 : i32
    %13 = scf.for %arg27 = %c0_i32 to %12 step %c1_i32 iter_args(%arg28 = %10) -> (vector<32x32xf32>)  : i32 {
      %c0_i32_20 = arith.constant 0 : i32
      %c2_i32_21 = arith.constant 2 : i32
      %25 = arith.addi %c0_i32_20, %c2_i32_21 : i32
      %c1_i32_22 = arith.constant 1 : i32
      %26 = scf.for %arg29 = %c0_i32_20 to %25 step %c1_i32_22 iter_args(%arg30 = %arg28) -> (vector<32x32xf32>)  : i32 {
        %27 = arith.index_cast %arg29 : i32 to index
        %c0_24 = arith.constant 0 : index
        %c0_25 = arith.constant 0 : index
        %28 = vector.load %arg15[%27, %c0_24, %c0_25] : memref<2x1x32xf32, #tpu.memory_space<vmem>>, vector<1x1x32xf32>
        %29 = vector.shape_cast %28 : vector<1x1x32xf32> to vector<1x32xf32>
        %30 = arith.index_cast %arg29 : i32 to index
        %c0_26 = arith.constant 0 : index
        %c0_27 = arith.constant 0 : index
        %31 = vector.load %arg16[%30, %c0_26, %c0_27] : memref<2x1x32xf32, #tpu.memory_space<vmem>>, vector<1x1x32xf32>
        %32 = vector.shape_cast %31 : vector<1x1x32xf32> to vector<1x32xf32>
        %cst_28 = arith.constant dense<0.000000e+00> : vector<32xf32>
        %33 = vector.multi_reduction <add>, %arg30, %cst_28 [1] : vector<32x32xf32> to vector<32xf32>
        %34 = vector.shape_cast %33 : vector<32xf32> to vector<32x1xf32>
        %cst_29 = arith.constant 3.200000e+01 : f32
        %35 = vector.broadcast %cst_29 : f32 to vector<32x1xf32>
        %36 = arith.divf %34, %35 : vector<32x1xf32>
        %37 = vector.broadcast %36 : vector<32x1xf32> to vector<32x32xf32>
        %38 = arith.subf %arg30, %37 : vector<32x32xf32>
        %39 = arith.mulf %38, %38 : vector<32x32xf32>
        %cst_30 = arith.constant dense<0.000000e+00> : vector<32xf32>
        %40 = vector.multi_reduction <add>, %39, %cst_30 [1] : vector<32x32xf32> to vector<32xf32>
        %41 = vector.shape_cast %40 : vector<32xf32> to vector<32x1xf32>
        %cst_31 = arith.constant 3.200000e+01 : f32
        %42 = vector.broadcast %cst_31 : f32 to vector<32x1xf32>
        %43 = arith.divf %41, %42 : vector<32x1xf32>
        %44 = vector.broadcast %36 : vector<32x1xf32> to vector<32x32xf32>
        %45 = arith.subf %arg30, %44 : vector<32x32xf32>
        %cst_32 = arith.constant 9.99999974E-6 : f32
        %46 = vector.broadcast %cst_32 : f32 to vector<32x1xf32>
        %47 = arith.addf %43, %46 : vector<32x1xf32>
        %48 = math.rsqrt %47 : vector<32x1xf32>
        %49 = vector.broadcast %48 : vector<32x1xf32> to vector<32x32xf32>
        %50 = arith.mulf %45, %49 : vector<32x32xf32>
        %51 = vector.broadcast %29 : vector<1x32xf32> to vector<32x32xf32>
        %52 = arith.mulf %50, %51 : vector<32x32xf32>
        %53 = vector.broadcast %32 : vector<1x32xf32> to vector<32x32xf32>
        %54 = arith.addf %52, %53 : vector<32x32xf32>
        %55 = arith.truncf %54 : vector<32x32xf32> to vector<32x32xbf16>
        %56 = arith.index_cast %arg29 : i32 to index
        %c0_33 = arith.constant 0 : index
        %c0_34 = arith.constant 0 : index
        %c0_35 = arith.constant 0 : index
        %57 = vector.load %arg7[%56, %c0_33, %c0_34, %c0_35] : memref<2x4x32x8xbf16, #tpu.memory_space<vmem>>, vector<1x4x32x8xbf16>
        %58 = vector.shape_cast %57 : vector<1x4x32x8xbf16> to vector<4x32x8xbf16>
        %59 = arith.index_cast %arg29 : i32 to index
        %c0_36 = arith.constant 0 : index
        %c0_37 = arith.constant 0 : index
        %c0_38 = arith.constant 0 : index
        %60 = vector.load %arg8[%59, %c0_36, %c0_37, %c0_38] : memref<2x4x32x8xbf16, #tpu.memory_space<vmem>>, vector<1x4x32x8xbf16>
        %61 = vector.shape_cast %60 : vector<1x4x32x8xbf16> to vector<4x32x8xbf16>
        %62 = arith.index_cast %arg29 : i32 to index
        %c0_39 = arith.constant 0 : index
        %c0_40 = arith.constant 0 : index
        %c0_41 = arith.constant 0 : index
        %63 = vector.load %arg9[%62, %c0_39, %c0_40, %c0_41] : memref<2x4x32x8xbf16, #tpu.memory_space<vmem>>, vector<1x4x32x8xbf16>
        %64 = vector.shape_cast %63 : vector<1x4x32x8xbf16> to vector<4x32x8xbf16>
        %65 = arith.index_cast %arg29 : i32 to index
        %c0_42 = arith.constant 0 : index
        %c0_43 = arith.constant 0 : index
        %66 = vector.load %arg10[%65, %c0_42, %c0_43] : memref<2x4x8xf32, #tpu.memory_space<vmem>>, vector<1x4x8xf32>
        %67 = vector.shape_cast %66 : vector<1x4x8xf32> to vector<4x8xf32>
        %68 = arith.index_cast %arg29 : i32 to index
        %c0_44 = arith.constant 0 : index
        %c0_45 = arith.constant 0 : index
        %69 = vector.load %arg11[%68, %c0_44, %c0_45] : memref<2x4x8xf32, #tpu.memory_space<vmem>>, vector<1x4x8xf32>
        %70 = vector.shape_cast %69 : vector<1x4x8xf32> to vector<4x8xf32>
        %71 = arith.index_cast %arg29 : i32 to index
        %c0_46 = arith.constant 0 : index
        %c0_47 = arith.constant 0 : index
        %72 = vector.load %arg12[%71, %c0_46, %c0_47] : memref<2x4x8xf32, #tpu.memory_space<vmem>>, vector<1x4x8xf32>
        %73 = vector.shape_cast %72 : vector<1x4x8xf32> to vector<4x8xf32>
        %74 = vector.extract_strided_slice %58 {offsets = [0, 0, 0], sizes = [1, 32, 8], strides = [1, 1, 1]} : vector<4x32x8xbf16> to vector<1x32x8xbf16>
        %75 = vector.shape_cast %74 : vector<1x32x8xbf16> to vector<32x8xbf16>
        %cst_48 = arith.constant dense<0.000000e+00> : vector<32x8xf32>
        %76 = tpu.matmul %55, %75, %cst_48 {dimension_numbers = #tpu.dot_dimension_numbers<[1], [0], [0], [1], [0, 0, 1, 1], [], []>} : vector<32x32xbf16>, vector<32x8xbf16>, vector<32x8xf32> -> vector<32x8xf32>
        %77 = vector.extract_strided_slice %67 {offsets = [0, 0], sizes = [1, 8], strides = [1, 1]} : vector<4x8xf32> to vector<1x8xf32>
        %78 = vector.broadcast %77 : vector<1x8xf32> to vector<32x8xf32>
        %79 = arith.addf %76, %78 : vector<32x8xf32>
        %80 = arith.truncf %79 : vector<32x8xf32> to vector<32x8xbf16>
        %81 = vector.extract_strided_slice %61 {offsets = [0, 0, 0], sizes = [1, 32, 8], strides = [1, 1, 1]} : vector<4x32x8xbf16> to vector<1x32x8xbf16>
        %82 = vector.shape_cast %81 : vector<1x32x8xbf16> to vector<32x8xbf16>
        %cst_49 = arith.constant dense<0.000000e+00> : vector<32x8xf32>
        %83 = tpu.matmul %55, %82, %cst_49 {dimension_numbers = #tpu.dot_dimension_numbers<[1], [0], [0], [1], [0, 0, 1, 1], [], []>} : vector<32x32xbf16>, vector<32x8xbf16>, vector<32x8xf32> -> vector<32x8xf32>
        %84 = vector.extract_strided_slice %70 {offsets = [0, 0], sizes = [1, 8], strides = [1, 1]} : vector<4x8xf32> to vector<1x8xf32>
        %85 = vector.broadcast %84 : vector<1x8xf32> to vector<32x8xf32>
        %86 = arith.addf %83, %85 : vector<32x8xf32>
        %87 = arith.truncf %86 : vector<32x8xf32> to vector<32x8xbf16>
        %88 = vector.extract_strided_slice %64 {offsets = [0, 0, 0], sizes = [1, 32, 8], strides = [1, 1, 1]} : vector<4x32x8xbf16> to vector<1x32x8xbf16>
        %89 = vector.shape_cast %88 : vector<1x32x8xbf16> to vector<32x8xbf16>
        %cst_50 = arith.constant dense<0.000000e+00> : vector<32x8xf32>
        %90 = tpu.matmul %55, %89, %cst_50 {dimension_numbers = #tpu.dot_dimension_numbers<[1], [0], [0], [1], [0, 0, 1, 1], [], []>} : vector<32x32xbf16>, vector<32x8xbf16>, vector<32x8xf32> -> vector<32x8xf32>
        %91 = vector.extract_strided_slice %73 {offsets = [0, 0], sizes = [1, 8], strides = [1, 1]} : vector<4x8xf32> to vector<1x8xf32>
        %92 = vector.broadcast %91 : vector<1x8xf32> to vector<32x8xf32>
        %93 = arith.addf %90, %92 : vector<32x8xf32>
        %94 = arith.truncf %93 : vector<32x8xf32> to vector<32x8xbf16>
        %95 = vector.shape_cast %80 : vector<32x8xbf16> to vector<2x16x8xbf16>
        %96 = vector.shape_cast %87 : vector<32x8xbf16> to vector<2x16x8xbf16>
        %97 = vector.shape_cast %94 : vector<32x8xbf16> to vector<2x16x8xbf16>
        "tpu.trace_start"() <{level = 10 : i32, message = "bqd,bkd->bqk"}> : () -> ()
        %cst_51 = arith.constant dense<0.000000e+00> : vector<2x16x16xf32>
        %98 = tpu.matmul %95, %96, %cst_51 {dimension_numbers = #tpu.dot_dimension_numbers<[2], [2], [1], [1], [0, 0, 0, 1, 1, 1], [0], [0]>} : vector<2x16x8xbf16>, vector<2x16x8xbf16>, vector<2x16x16xf32> -> vector<2x16x16xf32>
        "tpu.trace_stop"() : () -> ()
        %cst_52 = arith.constant 0.353553385 : f32
        %99 = vector.broadcast %cst_52 : f32 to vector<2x16x16xf32>
        %100 = arith.mulf %98, %99 : vector<2x16x16xf32>
        %101 = vector.shape_cast %11 : vector<1x16xf32> to vector<1x1x16xf32>
        %102 = vector.broadcast %101 : vector<1x1x16xf32> to vector<2x16x16xf32>
        %103 = arith.addf %100, %102 : vector<2x16x16xf32>
        %cst_53 = arith.constant dense<0xFF800000> : vector<2x16xf32>
        %104 = vector.multi_reduction <maximumf>, %103, %cst_53 [2] : vector<2x16x16xf32> to vector<2x16xf32>
        %105 = vector.shape_cast %104 : vector<2x16xf32> to vector<2x16x1xf32>
        %106 = vector.broadcast %105 : vector<2x16x1xf32> to vector<2x16x16xf32>
        %107 = arith.subf %103, %106 : vector<2x16x16xf32>
        %108 = math.exp %107 : vector<2x16x16xf32>
        %cst_54 = arith.constant dense<0.000000e+00> : vector<2x16xf32>
        %109 = vector.multi_reduction <add>, %108, %cst_54 [2] : vector<2x16x16xf32> to vector<2x16xf32>
        %110 = vector.shape_cast %109 : vector<2x16xf32> to vector<2x16x1xf32>
        %111 = tpu.reciprocal %110 {approx = true} : vector<2x16x1xf32> -> vector<2x16x1xf32>
        %112 = vector.broadcast %111 : vector<2x16x1xf32> to vector<2x16x16xf32>
        %113 = arith.mulf %108, %112 : vector<2x16x16xf32>
        %114 = arith.truncf %113 : vector<2x16x16xf32> to vector<2x16x16xbf16>
        "tpu.trace_start"() <{level = 10 : i32, message = "bqk,bkd->bqd"}> : () -> ()
        %cst_55 = arith.constant dense<0.000000e+00> : vector<2x16x8xf32>
        %115 = tpu.matmul %114, %97, %cst_55 {dimension_numbers = #tpu.dot_dimension_numbers<[2], [1], [1], [2], [0, 0, 0, 1, 1, 2], [0], [0]>} : vector<2x16x16xbf16>, vector<2x16x8xbf16>, vector<2x16x8xf32> -> vector<2x16x8xf32>
        "tpu.trace_stop"() : () -> ()
        %116 = vector.shape_cast %115 : vector<2x16x8xf32> to vector<32x8xf32>
        %117 = vector.extract_strided_slice %58 {offsets = [1, 0, 0], sizes = [1, 32, 8], strides = [1, 1, 1]} : vector<4x32x8xbf16> to vector<1x32x8xbf16>
        %118 = vector.shape_cast %117 : vector<1x32x8xbf16> to vector<32x8xbf16>
        %cst_56 = arith.constant dense<0.000000e+00> : vector<32x8xf32>
        %119 = tpu.matmul %55, %118, %cst_56 {dimension_numbers = #tpu.dot_dimension_numbers<[1], [0], [0], [1], [0, 0, 1, 1], [], []>} : vector<32x32xbf16>, vector<32x8xbf16>, vector<32x8xf32> -> vector<32x8xf32>
        %120 = vector.extract_strided_slice %67 {offsets = [1, 0], sizes = [1, 8], strides = [1, 1]} : vector<4x8xf32> to vector<1x8xf32>
        %121 = vector.broadcast %120 : vector<1x8xf32> to vector<32x8xf32>
        %122 = arith.addf %119, %121 : vector<32x8xf32>
        %123 = arith.truncf %122 : vector<32x8xf32> to vector<32x8xbf16>
        %124 = vector.extract_strided_slice %61 {offsets = [1, 0, 0], sizes = [1, 32, 8], strides = [1, 1, 1]} : vector<4x32x8xbf16> to vector<1x32x8xbf16>
        %125 = vector.shape_cast %124 : vector<1x32x8xbf16> to vector<32x8xbf16>
        %cst_57 = arith.constant dense<0.000000e+00> : vector<32x8xf32>
        %126 = tpu.matmul %55, %125, %cst_57 {dimension_numbers = #tpu.dot_dimension_numbers<[1], [0], [0], [1], [0, 0, 1, 1], [], []>} : vector<32x32xbf16>, vector<32x8xbf16>, vector<32x8xf32> -> vector<32x8xf32>
        %127 = vector.extract_strided_slice %70 {offsets = [1, 0], sizes = [1, 8], strides = [1, 1]} : vector<4x8xf32> to vector<1x8xf32>
        %128 = vector.broadcast %127 : vector<1x8xf32> to vector<32x8xf32>
        %129 = arith.addf %126, %128 : vector<32x8xf32>
        %130 = arith.truncf %129 : vector<32x8xf32> to vector<32x8xbf16>
        %131 = vector.extract_strided_slice %64 {offsets = [1, 0, 0], sizes = [1, 32, 8], strides = [1, 1, 1]} : vector<4x32x8xbf16> to vector<1x32x8xbf16>
        %132 = vector.shape_cast %131 : vector<1x32x8xbf16> to vector<32x8xbf16>
        %cst_58 = arith.constant dense<0.000000e+00> : vector<32x8xf32>
        %133 = tpu.matmul %55, %132, %cst_58 {dimension_numbers = #tpu.dot_dimension_numbers<[1], [0], [0], [1], [0, 0, 1, 1], [], []>} : vector<32x32xbf16>, vector<32x8xbf16>, vector<32x8xf32> -> vector<32x8xf32>
        %134 = vector.extract_strided_slice %73 {offsets = [1, 0], sizes = [1, 8], strides = [1, 1]} : vector<4x8xf32> to vector<1x8xf32>
        %135 = vector.broadcast %134 : vector<1x8xf32> to vector<32x8xf32>
        %136 = arith.addf %133, %135 : vector<32x8xf32>
        %137 = arith.truncf %136 : vector<32x8xf32> to vector<32x8xbf16>
        %138 = vector.shape_cast %123 : vector<32x8xbf16> to vector<2x16x8xbf16>
        %139 = vector.shape_cast %130 : vector<32x8xbf16> to vector<2x16x8xbf16>
        %140 = vector.shape_cast %137 : vector<32x8xbf16> to vector<2x16x8xbf16>
        "tpu.trace_start"() <{level = 10 : i32, message = "bqd,bkd->bqk"}> : () -> ()
        %cst_59 = arith.constant dense<0.000000e+00> : vector<2x16x16xf32>
        %141 = tpu.matmul %138, %139, %cst_59 {dimension_numbers = #tpu.dot_dimension_numbers<[2], [2], [1], [1], [0, 0, 0, 1, 1, 1], [0], [0]>} : vector<2x16x8xbf16>, vector<2x16x8xbf16>, vector<2x16x16xf32> -> vector<2x16x16xf32>
        "tpu.trace_stop"() : () -> ()
        %cst_60 = arith.constant 0.353553385 : f32
        %142 = vector.broadcast %cst_60 : f32 to vector<2x16x16xf32>
        %143 = arith.mulf %141, %142 : vector<2x16x16xf32>
        %144 = vector.shape_cast %11 : vector<1x16xf32> to vector<1x1x16xf32>
        %145 = vector.broadcast %144 : vector<1x1x16xf32> to vector<2x16x16xf32>
        %146 = arith.addf %143, %145 : vector<2x16x16xf32>
        %cst_61 = arith.constant dense<0xFF800000> : vector<2x16xf32>
        %147 = vector.multi_reduction <maximumf>, %146, %cst_61 [2] : vector<2x16x16xf32> to vector<2x16xf32>
        %148 = vector.shape_cast %147 : vector<2x16xf32> to vector<2x16x1xf32>
        %149 = vector.broadcast %148 : vector<2x16x1xf32> to vector<2x16x16xf32>
        %150 = arith.subf %146, %149 : vector<2x16x16xf32>
        %151 = math.exp %150 : vector<2x16x16xf32>
        %cst_62 = arith.constant dense<0.000000e+00> : vector<2x16xf32>
        %152 = vector.multi_reduction <add>, %151, %cst_62 [2] : vector<2x16x16xf32> to vector<2x16xf32>
        %153 = vector.shape_cast %152 : vector<2x16xf32> to vector<2x16x1xf32>
        %154 = tpu.reciprocal %153 {approx = true} : vector<2x16x1xf32> -> vector<2x16x1xf32>
        %155 = vector.broadcast %154 : vector<2x16x1xf32> to vector<2x16x16xf32>
        %156 = arith.mulf %151, %155 : vector<2x16x16xf32>
        %157 = arith.truncf %156 : vector<2x16x16xf32> to vector<2x16x16xbf16>
        "tpu.trace_start"() <{level = 10 : i32, message = "bqk,bkd->bqd"}> : () -> ()
        %cst_63 = arith.constant dense<0.000000e+00> : vector<2x16x8xf32>
        %158 = tpu.matmul %157, %140, %cst_63 {dimension_numbers = #tpu.dot_dimension_numbers<[2], [1], [1], [2], [0, 0, 0, 1, 1, 2], [0], [0]>} : vector<2x16x16xbf16>, vector<2x16x8xbf16>, vector<2x16x8xf32> -> vector<2x16x8xf32>
        "tpu.trace_stop"() : () -> ()
        %159 = vector.shape_cast %158 : vector<2x16x8xf32> to vector<32x8xf32>
        %160 = vector.extract_strided_slice %58 {offsets = [2, 0, 0], sizes = [1, 32, 8], strides = [1, 1, 1]} : vector<4x32x8xbf16> to vector<1x32x8xbf16>
        %161 = vector.shape_cast %160 : vector<1x32x8xbf16> to vector<32x8xbf16>
        %cst_64 = arith.constant dense<0.000000e+00> : vector<32x8xf32>
        %162 = tpu.matmul %55, %161, %cst_64 {dimension_numbers = #tpu.dot_dimension_numbers<[1], [0], [0], [1], [0, 0, 1, 1], [], []>} : vector<32x32xbf16>, vector<32x8xbf16>, vector<32x8xf32> -> vector<32x8xf32>
        %163 = vector.extract_strided_slice %67 {offsets = [2, 0], sizes = [1, 8], strides = [1, 1]} : vector<4x8xf32> to vector<1x8xf32>
        %164 = vector.broadcast %163 : vector<1x8xf32> to vector<32x8xf32>
        %165 = arith.addf %162, %164 : vector<32x8xf32>
        %166 = arith.truncf %165 : vector<32x8xf32> to vector<32x8xbf16>
        %167 = vector.extract_strided_slice %61 {offsets = [2, 0, 0], sizes = [1, 32, 8], strides = [1, 1, 1]} : vector<4x32x8xbf16> to vector<1x32x8xbf16>
        %168 = vector.shape_cast %167 : vector<1x32x8xbf16> to vector<32x8xbf16>
        %cst_65 = arith.constant dense<0.000000e+00> : vector<32x8xf32>
        %169 = tpu.matmul %55, %168, %cst_65 {dimension_numbers = #tpu.dot_dimension_numbers<[1], [0], [0], [1], [0, 0, 1, 1], [], []>} : vector<32x32xbf16>, vector<32x8xbf16>, vector<32x8xf32> -> vector<32x8xf32>
        %170 = vector.extract_strided_slice %70 {offsets = [2, 0], sizes = [1, 8], strides = [1, 1]} : vector<4x8xf32> to vector<1x8xf32>
        %171 = vector.broadcast %170 : vector<1x8xf32> to vector<32x8xf32>
        %172 = arith.addf %169, %171 : vector<32x8xf32>
        %173 = arith.truncf %172 : vector<32x8xf32> to vector<32x8xbf16>
        %174 = vector.extract_strided_slice %64 {offsets = [2, 0, 0], sizes = [1, 32, 8], strides = [1, 1, 1]} : vector<4x32x8xbf16> to vector<1x32x8xbf16>
        %175 = vector.shape_cast %174 : vector<1x32x8xbf16> to vector<32x8xbf16>
        %cst_66 = arith.constant dense<0.000000e+00> : vector<32x8xf32>
        %176 = tpu.matmul %55, %175, %cst_66 {dimension_numbers = #tpu.dot_dimension_numbers<[1], [0], [0], [1], [0, 0, 1, 1], [], []>} : vector<32x32xbf16>, vector<32x8xbf16>, vector<32x8xf32> -> vector<32x8xf32>
        %177 = vector.extract_strided_slice %73 {offsets = [2, 0], sizes = [1, 8], strides = [1, 1]} : vector<4x8xf32> to vector<1x8xf32>
        %178 = vector.broadcast %177 : vector<1x8xf32> to vector<32x8xf32>
        %179 = arith.addf %176, %178 : vector<32x8xf32>
        %180 = arith.truncf %179 : vector<32x8xf32> to vector<32x8xbf16>
        %181 = vector.shape_cast %166 : vector<32x8xbf16> to vector<2x16x8xbf16>
        %182 = vector.shape_cast %173 : vector<32x8xbf16> to vector<2x16x8xbf16>
        %183 = vector.shape_cast %180 : vector<32x8xbf16> to vector<2x16x8xbf16>
        "tpu.trace_start"() <{level = 10 : i32, message = "bqd,bkd->bqk"}> : () -> ()
        %cst_67 = arith.constant dense<0.000000e+00> : vector<2x16x16xf32>
        %184 = tpu.matmul %181, %182, %cst_67 {dimension_numbers = #tpu.dot_dimension_numbers<[2], [2], [1], [1], [0, 0, 0, 1, 1, 1], [0], [0]>} : vector<2x16x8xbf16>, vector<2x16x8xbf16>, vector<2x16x16xf32> -> vector<2x16x16xf32>
        "tpu.trace_stop"() : () -> ()
        %cst_68 = arith.constant 0.353553385 : f32
        %185 = vector.broadcast %cst_68 : f32 to vector<2x16x16xf32>
        %186 = arith.mulf %184, %185 : vector<2x16x16xf32>
        %187 = vector.shape_cast %11 : vector<1x16xf32> to vector<1x1x16xf32>
        %188 = vector.broadcast %187 : vector<1x1x16xf32> to vector<2x16x16xf32>
        %189 = arith.addf %186, %188 : vector<2x16x16xf32>
        %cst_69 = arith.constant dense<0xFF800000> : vector<2x16xf32>
        %190 = vector.multi_reduction <maximumf>, %189, %cst_69 [2] : vector<2x16x16xf32> to vector<2x16xf32>
        %191 = vector.shape_cast %190 : vector<2x16xf32> to vector<2x16x1xf32>
        %192 = vector.broadcast %191 : vector<2x16x1xf32> to vector<2x16x16xf32>
        %193 = arith.subf %189, %192 : vector<2x16x16xf32>
        %194 = math.exp %193 : vector<2x16x16xf32>
        %cst_70 = arith.constant dense<0.000000e+00> : vector<2x16xf32>
        %195 = vector.multi_reduction <add>, %194, %cst_70 [2] : vector<2x16x16xf32> to vector<2x16xf32>
        %196 = vector.shape_cast %195 : vector<2x16xf32> to vector<2x16x1xf32>
        %197 = tpu.reciprocal %196 {approx = true} : vector<2x16x1xf32> -> vector<2x16x1xf32>
        %198 = vector.broadcast %197 : vector<2x16x1xf32> to vector<2x16x16xf32>
        %199 = arith.mulf %194, %198 : vector<2x16x16xf32>
        %200 = arith.truncf %199 : vector<2x16x16xf32> to vector<2x16x16xbf16>
        "tpu.trace_start"() <{level = 10 : i32, message = "bqk,bkd->bqd"}> : () -> ()
        %cst_71 = arith.constant dense<0.000000e+00> : vector<2x16x8xf32>
        %201 = tpu.matmul %200, %183, %cst_71 {dimension_numbers = #tpu.dot_dimension_numbers<[2], [1], [1], [2], [0, 0, 0, 1, 1, 2], [0], [0]>} : vector<2x16x16xbf16>, vector<2x16x8xbf16>, vector<2x16x8xf32> -> vector<2x16x8xf32>
        "tpu.trace_stop"() : () -> ()
        %202 = vector.shape_cast %201 : vector<2x16x8xf32> to vector<32x8xf32>
        %203 = vector.extract_strided_slice %58 {offsets = [3, 0, 0], sizes = [1, 32, 8], strides = [1, 1, 1]} : vector<4x32x8xbf16> to vector<1x32x8xbf16>
        %204 = vector.shape_cast %203 : vector<1x32x8xbf16> to vector<32x8xbf16>
        %cst_72 = arith.constant dense<0.000000e+00> : vector<32x8xf32>
        %205 = tpu.matmul %55, %204, %cst_72 {dimension_numbers = #tpu.dot_dimension_numbers<[1], [0], [0], [1], [0, 0, 1, 1], [], []>} : vector<32x32xbf16>, vector<32x8xbf16>, vector<32x8xf32> -> vector<32x8xf32>
        %206 = vector.extract_strided_slice %67 {offsets = [3, 0], sizes = [1, 8], strides = [1, 1]} : vector<4x8xf32> to vector<1x8xf32>
        %207 = vector.broadcast %206 : vector<1x8xf32> to vector<32x8xf32>
        %208 = arith.addf %205, %207 : vector<32x8xf32>
        %209 = arith.truncf %208 : vector<32x8xf32> to vector<32x8xbf16>
        %210 = vector.extract_strided_slice %61 {offsets = [3, 0, 0], sizes = [1, 32, 8], strides = [1, 1, 1]} : vector<4x32x8xbf16> to vector<1x32x8xbf16>
        %211 = vector.shape_cast %210 : vector<1x32x8xbf16> to vector<32x8xbf16>
        %cst_73 = arith.constant dense<0.000000e+00> : vector<32x8xf32>
        %212 = tpu.matmul %55, %211, %cst_73 {dimension_numbers = #tpu.dot_dimension_numbers<[1], [0], [0], [1], [0, 0, 1, 1], [], []>} : vector<32x32xbf16>, vector<32x8xbf16>, vector<32x8xf32> -> vector<32x8xf32>
        %213 = vector.extract_strided_slice %70 {offsets = [3, 0], sizes = [1, 8], strides = [1, 1]} : vector<4x8xf32> to vector<1x8xf32>
        %214 = vector.broadcast %213 : vector<1x8xf32> to vector<32x8xf32>
        %215 = arith.addf %212, %214 : vector<32x8xf32>
        %216 = arith.truncf %215 : vector<32x8xf32> to vector<32x8xbf16>
        %217 = vector.extract_strided_slice %64 {offsets = [3, 0, 0], sizes = [1, 32, 8], strides = [1, 1, 1]} : vector<4x32x8xbf16> to vector<1x32x8xbf16>
        %218 = vector.shape_cast %217 : vector<1x32x8xbf16> to vector<32x8xbf16>
        %cst_74 = arith.constant dense<0.000000e+00> : vector<32x8xf32>
        %219 = tpu.matmul %55, %218, %cst_74 {dimension_numbers = #tpu.dot_dimension_numbers<[1], [0], [0], [1], [0, 0, 1, 1], [], []>} : vector<32x32xbf16>, vector<32x8xbf16>, vector<32x8xf32> -> vector<32x8xf32>
        %220 = vector.extract_strided_slice %73 {offsets = [3, 0], sizes = [1, 8], strides = [1, 1]} : vector<4x8xf32> to vector<1x8xf32>
        %221 = vector.broadcast %220 : vector<1x8xf32> to vector<32x8xf32>
        %222 = arith.addf %219, %221 : vector<32x8xf32>
        %223 = arith.truncf %222 : vector<32x8xf32> to vector<32x8xbf16>
        %224 = vector.shape_cast %209 : vector<32x8xbf16> to vector<2x16x8xbf16>
        %225 = vector.shape_cast %216 : vector<32x8xbf16> to vector<2x16x8xbf16>
        %226 = vector.shape_cast %223 : vector<32x8xbf16> to vector<2x16x8xbf16>
        "tpu.trace_start"() <{level = 10 : i32, message = "bqd,bkd->bqk"}> : () -> ()
        %cst_75 = arith.constant dense<0.000000e+00> : vector<2x16x16xf32>
        %227 = tpu.matmul %224, %225, %cst_75 {dimension_numbers = #tpu.dot_dimension_numbers<[2], [2], [1], [1], [0, 0, 0, 1, 1, 1], [0], [0]>} : vector<2x16x8xbf16>, vector<2x16x8xbf16>, vector<2x16x16xf32> -> vector<2x16x16xf32>
        "tpu.trace_stop"() : () -> ()
        %cst_76 = arith.constant 0.353553385 : f32
        %228 = vector.broadcast %cst_76 : f32 to vector<2x16x16xf32>
        %229 = arith.mulf %227, %228 : vector<2x16x16xf32>
        %230 = vector.shape_cast %11 : vector<1x16xf32> to vector<1x1x16xf32>
        %231 = vector.broadcast %230 : vector<1x1x16xf32> to vector<2x16x16xf32>
        %232 = arith.addf %229, %231 : vector<2x16x16xf32>
        %cst_77 = arith.constant dense<0xFF800000> : vector<2x16xf32>
        %233 = vector.multi_reduction <maximumf>, %232, %cst_77 [2] : vector<2x16x16xf32> to vector<2x16xf32>
        %234 = vector.shape_cast %233 : vector<2x16xf32> to vector<2x16x1xf32>
        %235 = vector.broadcast %234 : vector<2x16x1xf32> to vector<2x16x16xf32>
        %236 = arith.subf %232, %235 : vector<2x16x16xf32>
        %237 = math.exp %236 : vector<2x16x16xf32>
        %cst_78 = arith.constant dense<0.000000e+00> : vector<2x16xf32>
        %238 = vector.multi_reduction <add>, %237, %cst_78 [2] : vector<2x16x16xf32> to vector<2x16xf32>
        %239 = vector.shape_cast %238 : vector<2x16xf32> to vector<2x16x1xf32>
        %240 = tpu.reciprocal %239 {approx = true} : vector<2x16x1xf32> -> vector<2x16x1xf32>
        %241 = vector.broadcast %240 : vector<2x16x1xf32> to vector<2x16x16xf32>
        %242 = arith.mulf %237, %241 : vector<2x16x16xf32>
        %243 = arith.truncf %242 : vector<2x16x16xf32> to vector<2x16x16xbf16>
        "tpu.trace_start"() <{level = 10 : i32, message = "bqk,bkd->bqd"}> : () -> ()
        %cst_79 = arith.constant dense<0.000000e+00> : vector<2x16x8xf32>
        %244 = tpu.matmul %243, %226, %cst_79 {dimension_numbers = #tpu.dot_dimension_numbers<[2], [1], [1], [2], [0, 0, 0, 1, 1, 2], [0], [0]>} : vector<2x16x16xbf16>, vector<2x16x8xbf16>, vector<2x16x8xf32> -> vector<2x16x8xf32>
        "tpu.trace_stop"() : () -> ()
        %245 = vector.shape_cast %244 : vector<2x16x8xf32> to vector<32x8xf32>
        %246 = tpu.concatenate %116, %159, %202, %245 in 1 : vector<32x8xf32>, vector<32x8xf32>, vector<32x8xf32>, vector<32x8xf32> -> vector<32x32xf32>
        %247 = arith.truncf %246 : vector<32x32xf32> to vector<32x32xbf16>
        %248 = arith.index_cast %arg29 : i32 to index
        %c0_80 = arith.constant 0 : index
        %c0_81 = arith.constant 0 : index
        %249 = vector.load %arg13[%248, %c0_80, %c0_81] : memref<2x32x32xbf16, #tpu.memory_space<vmem>>, vector<1x32x32xbf16>
        %250 = vector.shape_cast %249 : vector<1x32x32xbf16> to vector<32x32xbf16>
        %cst_82 = arith.constant dense<0.000000e+00> : vector<32x32xf32>
        %251 = tpu.matmul %247, %250, %cst_82 {dimension_numbers = #tpu.dot_dimension_numbers<[1], [0], [0], [1], [0, 0, 1, 1], [], []>} : vector<32x32xbf16>, vector<32x32xbf16>, vector<32x32xf32> -> vector<32x32xf32>
        %252 = arith.index_cast %arg29 : i32 to index
        %c0_83 = arith.constant 0 : index
        %c0_84 = arith.constant 0 : index
        %253 = vector.load %arg14[%252, %c0_83, %c0_84] : memref<2x1x32xf32, #tpu.memory_space<vmem>>, vector<1x1x32xf32>
        %254 = vector.shape_cast %253 : vector<1x1x32xf32> to vector<1x32xf32>
        %255 = vector.broadcast %254 : vector<1x32xf32> to vector<32x32xf32>
        %256 = arith.addf %251, %255 : vector<32x32xf32>
        %257 = arith.addf %arg30, %256 : vector<32x32xf32>
        %258 = arith.index_cast %arg29 : i32 to index
        %c0_85 = arith.constant 0 : index
        %c0_86 = arith.constant 0 : index
        %259 = vector.load %arg17[%258, %c0_85, %c0_86] : memref<2x1x32xf32, #tpu.memory_space<vmem>>, vector<1x1x32xf32>
        %260 = vector.shape_cast %259 : vector<1x1x32xf32> to vector<1x32xf32>
        %261 = arith.index_cast %arg29 : i32 to index
        %c0_87 = arith.constant 0 : index
        %c0_88 = arith.constant 0 : index
        %262 = vector.load %arg18[%261, %c0_87, %c0_88] : memref<2x1x32xf32, #tpu.memory_space<vmem>>, vector<1x1x32xf32>
        %263 = vector.shape_cast %262 : vector<1x1x32xf32> to vector<1x32xf32>
        %cst_89 = arith.constant dense<0.000000e+00> : vector<32xf32>
        %264 = vector.multi_reduction <add>, %257, %cst_89 [1] : vector<32x32xf32> to vector<32xf32>
        %265 = vector.shape_cast %264 : vector<32xf32> to vector<32x1xf32>
        %cst_90 = arith.constant 3.200000e+01 : f32
        %266 = vector.broadcast %cst_90 : f32 to vector<32x1xf32>
        %267 = arith.divf %265, %266 : vector<32x1xf32>
        %268 = vector.broadcast %267 : vector<32x1xf32> to vector<32x32xf32>
        %269 = arith.subf %257, %268 : vector<32x32xf32>
        %270 = arith.mulf %269, %269 : vector<32x32xf32>
        %cst_91 = arith.constant dense<0.000000e+00> : vector<32xf32>
        %271 = vector.multi_reduction <add>, %270, %cst_91 [1] : vector<32x32xf32> to vector<32xf32>
        %272 = vector.shape_cast %271 : vector<32xf32> to vector<32x1xf32>
        %cst_92 = arith.constant 3.200000e+01 : f32
        %273 = vector.broadcast %cst_92 : f32 to vector<32x1xf32>
        %274 = arith.divf %272, %273 : vector<32x1xf32>
        %275 = vector.broadcast %267 : vector<32x1xf32> to vector<32x32xf32>
        %276 = arith.subf %257, %275 : vector<32x32xf32>
        %cst_93 = arith.constant 9.99999974E-6 : f32
        %277 = vector.broadcast %cst_93 : f32 to vector<32x1xf32>
        %278 = arith.addf %274, %277 : vector<32x1xf32>
        %279 = math.rsqrt %278 : vector<32x1xf32>
        %280 = vector.broadcast %279 : vector<32x1xf32> to vector<32x32xf32>
        %281 = arith.mulf %276, %280 : vector<32x32xf32>
        %282 = vector.broadcast %260 : vector<1x32xf32> to vector<32x32xf32>
        %283 = arith.mulf %281, %282 : vector<32x32xf32>
        %284 = vector.broadcast %263 : vector<1x32xf32> to vector<32x32xf32>
        %285 = arith.addf %283, %284 : vector<32x32xf32>
        %286 = arith.truncf %285 : vector<32x32xf32> to vector<32x32xbf16>
        %287 = arith.index_cast %arg29 : i32 to index
        %c0_94 = arith.constant 0 : index
        %c0_95 = arith.constant 0 : index
        %288 = vector.load %arg19[%287, %c0_94, %c0_95] : memref<2x32x64xbf16, #tpu.memory_space<vmem>>, vector<1x32x64xbf16>
        %289 = vector.shape_cast %288 : vector<1x32x64xbf16> to vector<32x64xbf16>
        %cst_96 = arith.constant dense<0.000000e+00> : vector<32x64xf32>
        %290 = tpu.matmul %286, %289, %cst_96 {dimension_numbers = #tpu.dot_dimension_numbers<[1], [0], [0], [1], [0, 0, 1, 1], [], []>} : vector<32x32xbf16>, vector<32x64xbf16>, vector<32x64xf32> -> vector<32x64xf32>
        %291 = arith.index_cast %arg29 : i32 to index
        %c0_97 = arith.constant 0 : index
        %c0_98 = arith.constant 0 : index
        %292 = vector.load %arg20[%291, %c0_97, %c0_98] : memref<2x1x64xf32, #tpu.memory_space<vmem>>, vector<1x1x64xf32>
        %293 = vector.shape_cast %292 : vector<1x1x64xf32> to vector<1x64xf32>
        %294 = vector.broadcast %293 : vector<1x64xf32> to vector<32x64xf32>
        %295 = arith.addf %290, %294 : vector<32x64xf32>
        %cst_99 = arith.constant 0.000000e+00 : f32
        %296 = vector.broadcast %cst_99 : f32 to vector<32x64xf32>
        %297 = arith.maximumf %295, %296 : vector<32x64xf32>
        %298 = arith.truncf %297 : vector<32x64xf32> to vector<32x64xbf16>
        %299 = arith.index_cast %arg29 : i32 to index
        %c0_100 = arith.constant 0 : index
        %c0_101 = arith.constant 0 : index
        %300 = vector.load %arg21[%299, %c0_100, %c0_101] : memref<2x64x32xbf16, #tpu.memory_space<vmem>>, vector<1x64x32xbf16>
        %301 = vector.shape_cast %300 : vector<1x64x32xbf16> to vector<64x32xbf16>
        %cst_102 = arith.constant dense<0.000000e+00> : vector<32x32xf32>
        %302 = tpu.matmul %298, %301, %cst_102 {dimension_numbers = #tpu.dot_dimension_numbers<[1], [0], [0], [1], [0, 0, 1, 1], [], []>} : vector<32x64xbf16>, vector<64x32xbf16>, vector<32x32xf32> -> vector<32x32xf32>
        %303 = arith.index_cast %arg29 : i32 to index
        %c0_103 = arith.constant 0 : index
        %c0_104 = arith.constant 0 : index
        %304 = vector.load %arg22[%303, %c0_103, %c0_104] : memref<2x1x32xf32, #tpu.memory_space<vmem>>, vector<1x1x32xf32>
        %305 = vector.shape_cast %304 : vector<1x1x32xf32> to vector<1x32xf32>
        %306 = vector.broadcast %305 : vector<1x32xf32> to vector<32x32xf32>
        %307 = arith.addf %302, %306 : vector<32x32xf32>
        %308 = arith.addf %257, %307 : vector<32x32xf32>
        scf.yield %308 : vector<32x32xf32>
      }
      %c2_i32_23 = arith.constant 2 : i32
      scf.yield %26 : vector<32x32xf32>
    }
    %14 = vector.shape_cast %13 : vector<32x32xf32> to vector<2x16x32xf32>
    %15 = vector.extract_strided_slice %14 {offsets = [0, 0, 0], sizes = [2, 1, 32], strides = [1, 1, 1]} : vector<2x16x32xf32> to vector<2x1x32xf32>
    %16 = vector.shape_cast %15 : vector<2x1x32xf32> to vector<2x32xf32>
    %c0_11 = arith.constant 0 : index
    %c0_12 = arith.constant 0 : index
    %17 = vector.load %arg25[%c0_11, %c0_12] : memref<2x32xf32, #tpu.memory_space<vmem>>, vector<2x32xf32>
    tpu.vector_store %arg25[%c0_11, %c0_12], %16 {strides = array<i32>} : memref<2x32xf32, #tpu.memory_space<vmem>>, vector<2x32xf32>,
    %18 = arith.truncf %16 : vector<2x32xf32> to vector<2x32xbf16>
    %c0_13 = arith.constant 0 : index
    %c0_14 = arith.constant 0 : index
    %19 = vector.load %arg23[%c0_13, %c0_14] : memref<32x8xbf16, #tpu.memory_space<vmem>>, vector<32x8xbf16>
    %cst_15 = arith.constant dense<0.000000e+00> : vector<2x8xf32>
    %20 = tpu.matmul %18, %19, %cst_15 {dimension_numbers = #tpu.dot_dimension_numbers<[1], [0], [0], [1], [0, 0, 1, 1], [], []>} : vector<2x32xbf16>, vector<32x8xbf16>, vector<2x8xf32> -> vector<2x8xf32>
    %c0_16 = arith.constant 0 : index
    %c0_17 = arith.constant 0 : index
    %21 = vector.load %arg24[%c0_16, %c0_17] : memref<1x8xf32, #tpu.memory_space<vmem>>, vector<1x8xf32>
    %22 = vector.broadcast %21 : vector<1x8xf32> to vector<2x8xf32>
    %23 = arith.addf %20, %22 : vector<2x8xf32>
    %c0_18 = arith.constant 0 : index
    %c0_19 = arith.constant 0 : index
    %24 = vector.load %arg26[%c0_18, %c0_19] : memref<2x8xf32, #tpu.memory_space<vmem>>, vector<2x8xf32>
    tpu.vector_store %arg26[%c0_18, %c0_19], %23 {strides = array<i32>} : memref<2x8xf32, #tpu.memory_space<vmem>>, vector<2x8xf32>,
    return
  }
  func.func @transform_0(%arg0: i32) -> (i32, i32) {
    %c0_i32 = arith.constant 0 : i32
    %c0_i32_0 = arith.constant 0 : i32
    return %arg0, %c0_i32 : i32, i32
  }
  func.func @transform_1(%arg0: i32) -> (i32, i32) {
    %c0_i32 = arith.constant 0 : i32
    %c0_i32_0 = arith.constant 0 : i32
    return %arg0, %c0_i32 : i32, i32
  }
  func.func @transform_2(%arg0: i32) -> (i32, i32) {
    %c0_i32 = arith.constant 0 : i32
    %c0_i32_0 = arith.constant 0 : i32
    return %arg0, %c0_i32 : i32, i32
  }
  func.func @transform_3(%arg0: i32) -> (i32, i32) {
    %c0_i32 = arith.constant 0 : i32
    %c0_i32_0 = arith.constant 0 : i32
    %c0_i32_1 = arith.constant 0 : i32
    return %c0_i32, %c0_i32_0 : i32, i32
  }
  func.func @transform_4(%arg0: i32) -> (i32, i32) {
    %c0_i32 = arith.constant 0 : i32
    %c0_i32_0 = arith.constant 0 : i32
    %c0_i32_1 = arith.constant 0 : i32
    return %c0_i32, %c0_i32_0 : i32, i32
  }
  func.func @transform_5(%arg0: i32) -> (i32, i32) {
    %c0_i32 = arith.constant 0 : i32
    %c0_i32_0 = arith.constant 0 : i32
    %c0_i32_1 = arith.constant 0 : i32
    return %c0_i32, %c0_i32_0 : i32, i32
  }
  func.func @transform_6(%arg0: i32) -> (i32, i32, i32, i32) {
    %c0_i32 = arith.constant 0 : i32
    %c0_i32_0 = arith.constant 0 : i32
    %c0_i32_1 = arith.constant 0 : i32
    %c0_i32_2 = arith.constant 0 : i32
    %c0_i32_3 = arith.constant 0 : i32
    return %c0_i32, %c0_i32_0, %c0_i32_1, %c0_i32_2 : i32, i32, i32, i32
  }
  func.func @transform_7(%arg0: i32) -> (i32, i32, i32, i32) {
    %c0_i32 = arith.constant 0 : i32
    %c0_i32_0 = arith.constant 0 : i32
    %c0_i32_1 = arith.constant 0 : i32
    %c0_i32_2 = arith.constant 0 : i32
    %c0_i32_3 = arith.constant 0 : i32
    return %c0_i32, %c0_i32_0, %c0_i32_1, %c0_i32_2 : i32, i32, i32, i32
  }
  func.func @transform_8(%arg0: i32) -> (i32, i32, i32, i32) {
    %c0_i32 = arith.constant 0 : i32
    %c0_i32_0 = arith.constant 0 : i32
    %c0_i32_1 = arith.constant 0 : i32
    %c0_i32_2 = arith.constant 0 : i32
    %c0_i32_3 = arith.constant 0 : i32
    return %c0_i32, %c0_i32_0, %c0_i32_1, %c0_i32_2 : i32, i32, i32, i32
  }
  func.func @transform_9(%arg0: i32) -> (i32, i32, i32) {
    %c0_i32 = arith.constant 0 : i32
    %c0_i32_0 = arith.constant 0 : i32
    %c0_i32_1 = arith.constant 0 : i32
    %c0_i32_2 = arith.constant 0 : i32
    return %c0_i32, %c0_i32_0, %c0_i32_1 : i32, i32, i32
  }
  func.func @transform_10(%arg0: i32) -> (i32, i32, i32) {
    %c0_i32 = arith.constant 0 : i32
    %c0_i32_0 = arith.constant 0 : i32
    %c0_i32_1 = arith.constant 0 : i32
    %c0_i32_2 = arith.constant 0 : i32
    return %c0_i32, %c0_i32_0, %c0_i32_1 : i32, i32, i32
  }
  func.func @transform_11(%arg0: i32) -> (i32, i32, i32) {
    %c0_i32 = arith.constant 0 : i32
    %c0_i32_0 = arith.constant 0 : i32
    %c0_i32_1 = arith.constant 0 : i32
    %c0_i32_2 = arith.constant 0 : i32
    return %c0_i32, %c0_i32_0, %c0_i32_1 : i32, i32, i32
  }
  func.func @transform_12(%arg0: i32) -> (i32, i32, i32) {
    %c0_i32 = arith.constant 0 : i32
    %c0_i32_0 = arith.constant 0 : i32
    %c0_i32_1 = arith.constant 0 : i32
    %c0_i32_2 = arith.constant 0 : i32
    return %c0_i32, %c0_i32_0, %c0_i32_1 : i32, i32, i32
  }
  func.func @transform_13(%arg0: i32) -> (i32, i32, i32) {
    %c0_i32 = arith.constant 0 : i32
    %c0_i32_0 = arith.constant 0 : i32
    %c0_i32_1 = arith.constant 0 : i32
    %c0_i32_2 = arith.constant 0 : i32
    return %c0_i32, %c0_i32_0, %c0_i32_1 : i32, i32, i32
  }
  func.func @transform_14(%arg0: i32) -> (i32, i32, i32) {
    %c0_i32 = arith.constant 0 : i32
    %c0_i32_0 = arith.constant 0 : i32
    %c0_i32_1 = arith.constant 0 : i32
    %c0_i32_2 = arith.constant 0 : i32
    return %c0_i32, %c0_i32_0, %c0_i32_1 : i32, i32, i32
  }
  func.func @transform_15(%arg0: i32) -> (i32, i32, i32) {
    %c0_i32 = arith.constant 0 : i32
    %c0_i32_0 = arith.constant 0 : i32
    %c0_i32_1 = arith.constant 0 : i32
    %c0_i32_2 = arith.constant 0 : i32
    return %c0_i32, %c0_i32_0, %c0_i32_1 : i32, i32, i32
  }
  func.func @transform_16(%arg0: i32) -> (i32, i32, i32) {
    %c0_i32 = arith.constant 0 : i32
    %c0_i32_0 = arith.constant 0 : i32
    %c0_i32_1 = arith.constant 0 : i32
    %c0_i32_2 = arith.constant 0 : i32
    return %c0_i32, %c0_i32_0, %c0_i32_1 : i32, i32, i32
  }
  func.func @transform_17(%arg0: i32) -> (i32, i32, i32) {
    %c0_i32 = arith.constant 0 : i32
    %c0_i32_0 = arith.constant 0 : i32
    %c0_i32_1 = arith.constant 0 : i32
    %c0_i32_2 = arith.constant 0 : i32
    return %c0_i32, %c0_i32_0, %c0_i32_1 : i32, i32, i32
  }
  func.func @transform_18(%arg0: i32) -> (i32, i32, i32) {
    %c0_i32 = arith.constant 0 : i32
    %c0_i32_0 = arith.constant 0 : i32
    %c0_i32_1 = arith.constant 0 : i32
    %c0_i32_2 = arith.constant 0 : i32
    return %c0_i32, %c0_i32_0, %c0_i32_1 : i32, i32, i32
  }
  func.func @transform_19(%arg0: i32) -> (i32, i32, i32) {
    %c0_i32 = arith.constant 0 : i32
    %c0_i32_0 = arith.constant 0 : i32
    %c0_i32_1 = arith.constant 0 : i32
    %c0_i32_2 = arith.constant 0 : i32
    return %c0_i32, %c0_i32_0, %c0_i32_1 : i32, i32, i32
  }
  func.func @transform_20(%arg0: i32) -> (i32, i32, i32) {
    %c0_i32 = arith.constant 0 : i32
    %c0_i32_0 = arith.constant 0 : i32
    %c0_i32_1 = arith.constant 0 : i32
    %c0_i32_2 = arith.constant 0 : i32
    return %c0_i32, %c0_i32_0, %c0_i32_1 : i32, i32, i32
  }
  func.func @transform_21(%arg0: i32) -> (i32, i32, i32) {
    %c0_i32 = arith.constant 0 : i32
    %c0_i32_0 = arith.constant 0 : i32
    %c0_i32_1 = arith.constant 0 : i32
    %c0_i32_2 = arith.constant 0 : i32
    return %c0_i32, %c0_i32_0, %c0_i32_1 : i32, i32, i32
  }
  func.func @transform_22(%arg0: i32) -> (i32, i32) {
    %c0_i32 = arith.constant 0 : i32
    %c0_i32_0 = arith.constant 0 : i32
    %c0_i32_1 = arith.constant 0 : i32
    return %c0_i32, %c0_i32_0 : i32, i32
  }
  func.func @transform_23(%arg0: i32) -> (i32, i32) {
    %c0_i32 = arith.constant 0 : i32
    %c0_i32_0 = arith.constant 0 : i32
    %c0_i32_1 = arith.constant 0 : i32
    return %c0_i32, %c0_i32_0 : i32, i32
  }
  func.func @transform_24(%arg0: i32) -> (i32, i32) {
    %c0_i32 = arith.constant 0 : i32
    %c0_i32_0 = arith.constant 0 : i32
    return %arg0, %c0_i32 : i32, i32
  }
  func.func @transform_25(%arg0: i32) -> (i32, i32) {
    %c0_i32 = arith.constant 0 : i32
    %c0_i32_0 = arith.constant 0 : i32
    return %arg0, %c0_i32 : i32, i32
  }
}

</mosaic_0001>

<bundles_post_ra>
// kernel: tpu_custom_call.1
= control target key start
LH: loop header
LB: loop body
LE: loop exit
PB: predicated region body
PF: predicated region fallthrough
CT: control target
= control target key end

     0   :  { %s4281_s0 = inlined_call_operand.vmem [shape: bf16[32,80], index: 0, kind: input, shape index: {}]   ;;  %s4282_s1 = inlined_call_operand.vmem [shape: f32[32,1], index: 1, kind: input, shape index: {}]   ;;  %s4283_s2 = inlined_call_operand.vmem [shape: f32[32,32], index: 2, kind: input, shape index: {}]   ;;  %s4284_s3 = inlined_call_operand.vmem [shape: f32[1,16], index: 3, kind: input, shape index: {}]   ;;  %s4285_s4 = inlined_call_operand.vmem [shape: bf16[80,32], index: 4, kind: input, shape index: {}]   ;;  %s4286_s5 = inlined_call_operand.vmem [shape: f32[1,32], index: 5, kind: input, shape index: {}]   ;;  %s4287_s6 = inlined_call_operand.vmem [shape: bf16[2,4,32,8], index: 6, kind: input, shape index: {}]   ;;  %s4288_s7 = inlined_call_operand.vmem [shape: bf16[2,4,32,8], index: 7, kind: input, shape index: {}]   ;;  %s4289_s8 = inlined_call_operand.vmem [shape: bf16[2,4,32,8], index: 8, kind: input, shape index: {}]   ;;  %s4290_s9 = inlined_call_operand.vmem [shape: f32[2,4,8], index: 9, kind: input, shape index: {}]   ;;  %s4291_s10 = inlined_call_operand.vmem [shape: f32[2,4,8], index: 10, kind: input, shape index: {}]   ;;  %s4292_s11 = inlined_call_operand.vmem [shape: f32[2,4,8], index: 11, kind: input, shape index: {}]   ;;  %s4293_s12 = inlined_call_operand.vmem [shape: bf16[2,32,32], index: 12, kind: input, shape index: {}]   ;;  %s4294_s13 = inlined_call_operand.vmem [shape: f32[2,1,32], index: 13, kind: input, shape index: {}]   ;;  %s4295_s14 = inlined_call_operand.vmem [shape: f32[2,1,32], index: 14, kind: input, shape index: {}]   ;;  %s4296_s15 = inlined_call_operand.vmem [shape: f32[2,1,32], index: 15, kind: input, shape index: {}]   ;;  %s4297_s16 = inlined_call_operand.vmem [shape: f32[2,1,32], index: 16, kind: input, shape index: {}]   ;;  %s4298_s17 = inlined_call_operand.vmem [shape: f32[2,1,32], index: 17, kind: input, shape index: {}]   ;;  %s4299_s18 = inlined_call_operand.vmem [shape: bf16[2,32,64], index: 18, kind: input, shape index: {}]   ;;  %s4300_s19 = inlined_call_operand.vmem [shape: f32[2,1,64], index: 19, kind: input, shape index: {}]   ;;  %s4301_s20 = inlined_call_operand.vmem [shape: bf16[2,64,32], index: 20, kind: input, shape index: {}]   ;;  %s4302_s21 = inlined_call_operand.vmem [shape: f32[2,1,32], index: 21, kind: input, shape index: {}]   ;;  %s4303_s22 = inlined_call_operand.vmem [shape: bf16[32,8], index: 22, kind: input, shape index: {}]   ;;  %s4304_s23 = inlined_call_operand.vmem [shape: f32[1,8], index: 23, kind: input, shape index: {}]   ;;  %s4305_s24 = inlined_call_operand.hbm [shape: f32[2,32], index: 24, kind: output, shape index: {0}]   ;;  %s4306_s25 = inlined_call_operand.hbm [shape: f32[2,8], index: 25, kind: output, shape index: {1}]  }
   0x1   :  { %4311 = sst [smem:[#allocation8_spill]] %s4281_s0 }
   0x2   :  { %4312 = sst [smem:[#allocation9_spill]] %s4282_s1 }
   0x3   :  { %4313 = sst [smem:[#allocation10_spill]] %s4283_s2 }
   0x4   :  { %4314 = sst [smem:[#allocation11_spill]] %s4284_s3 }
   0x5   :  { %4315 = sst [smem:[#allocation12_spill]] %s4285_s4 }
   0x6   :  { %4316 = sst [smem:[#allocation13_spill]] %s4286_s5 }
   0x7   :  { %4317 = sst [smem:[#allocation14_spill]] %s4287_s6 }
   0x8   :  { %4318 = sst [smem:[#allocation15_spill]] %s4288_s7 }
   0x9   :  { %4319 = sst [smem:[#allocation16_spill]] %s4289_s8 }
   0xa   :  { %4320 = sst [smem:[#allocation17_spill]] %s4290_s9 }
   0xb   :  { %31 = vsyncpa [#allocation3], 0 }
   0xc   :  { %32 = vsyncpa [#allocation5], 0  ;;  %s4321_s6 = sld [smem:[#allocation12_spill]]  ;;  %v3581_v2 = vmov 0   ;;  %vm143_vm0 = vcmask 654336   ;;  %s4322_s27 = sld [smem:[#allocation8_spill]] }
   0xd   :  { %3301 = vset.pattern.permute.xlu1 %v3581_v2  ;;  %3300 = vset.pattern.permute.xlu0 %v3581_v2  ;;  %s4323_s9 = sld [smem:[#allocation9_spill]]  ;;  %s3784_s5 = smov 0  }
  0x12   :  { %v3302_v0 = vld [vmem:[%s4321_s6] sm:$0xff]   ;;  %v3303_v1 = vld [vmem:[%s4321_s6 + $0x8] sm:$0xff]   ;;  %v3304_v3 = vld [vmem:[%s4321_s6 + $0x10] sm:$0xff]  }
  0x13   :  { %2968 = vmatprep.subr.bf16.mxu0 %v3302_v0  ;;  %v3307_v4 = vld [vmem:[%s4322_s27] sm:$0xff]   ;;  %v201_v5 = vld [vmem:[%s4323_s9 + $0x10] sm:$0xff]  ;;  %v3305_v7 = vld [vmem:[%s4321_s6 + $0x18] sm:$0xff]  }
  0x14   :  { %2969 = vmatpush3.bf16.msra.mxu0 %v3302_v0  ;;  %v199_v6 = vld [vmem:[%s4323_s9] sm:$0xff]  ;;  %2978 = vmatprep.mubr.msk.bf16.mxu0 %vm143_vm0, %v3307_v4  ;;  %v202_v8 = vld [vmem:[%s4323_s9 + $0x18] sm:$0xff]  ;;  %v200_v9 = vld [vmem:[%s4323_s9 + $0x8] sm:$0xff]  ;;  %s4324_s9 = sld [smem:[#allocation11_spill]] }
  0x15   :  { %2970 = vmatprep.subr.bf16.mxu0 %v3303_v1  ;;  %215 = vperm.xlu1 %3301, %v201_v5   ;;  %v3306_v10 = vld [vmem:[%s4321_s6 + $0x20] sm:$0xff]   ;;  %v3308_v11 = vld [vmem:[%s4322_s27 + $0x8] sm:$0xff]   ;;  %s4325_s6 = sld [smem:[#allocation13_spill]]  ;;  %s4326_s27 = sld [smem:[#allocation10_spill]] }
  0x16   :  { %205 = vperm.xlu0 %3300, %v199_v6  }
  0x18   :  { %2971 = vmatpush3.bf16.msra.mxu0 %v3303_v1 }
  0x19   :  { %2972 = vmatprep.subr.bf16.mxu0 %v3304_v3  ;;  %220 = vperm.xlu1 %3301, %v202_v8  }
  0x1a   :  { %210 = vperm.xlu0 %3300, %v200_v9   ;;  %v3759_v12 = vld [vmem:[%s4324_s9] ss:$0 sm:$0xff] }
  0x1b   :  { %v2749_v14 = vld [vmem:[%s4325_s6] ss:$0 sm:$0xff]  ;;  %v229_v19 = vld [vmem:[%s4326_s27 + $0x10] sm:$0xff]  ;;  %v230_v28 = vld [vmem:[%s4326_s27 + $0x18] sm:$0xff] }
  0x1c   :  { %2973 = vmatpush3.bf16.msra.mxu0 %v3304_v3  ;;  %v227_v23 = vld [vmem:[%s4326_s27] sm:$0xff]  ;;  %v228_v33 = vld [vmem:[%s4326_s27 + $0x8] sm:$0xff] }
  0x1d   :  { %2974 = vmatprep.subr.bf16.mxu0 %v3305_v7 }
  0x20   :  { %2975 = vmatpush3.bf16.msra.mxu0 %v3305_v7 }
  0x21   :  { %2976 = vmatprep.subr.bf16.mxu0 %v3306_v10 }
  0x24   :  { %2977 = vmatpush3.bf16.msra.mxu0 %v3306_v10 }
  0x27   :  { %2979 = vmatmul.mubr.msk.bf16.vlgmr.msra.gmra.mrb[0].mxu0 %vm143_vm0, %v3308_v11 }
  0x94   :  { %v216_v13 = vpop.permute.xlu1 %215 }
  0x95   :  { %v206_v15 = vpop.permute.xlu0 %205 }
  0x98   :  { %v221_v26 = vpop.permute.xlu1 %220 }
  0x99   :  { %v211_v31 = vpop.permute.xlu0 %210 }
  0xfa   :  { %v2980_v16 = vpop.f32.mrb[0].mxu0 }
  0xfb   :  { %v193_v17 = vadd.f32 %v2980_v16, %v2749_v14  ;;  %v184_v18 = vpop.f32.mrb[1].mxu0 }
  0xfc   :  { %v185_v20 = vadd.f32 %v2749_v14, %v184_v18  ;;  %v2981_v21 = vpop.f32.mrb[2].mxu0 }
  0xfd   :  { %v225_v22 = vmul.f32 %v216_v13, %v193_v17  ;;  %v196_v24 = vadd.f32 %v2981_v21, %v2749_v14  ;;  %v187_v25 = vpop.f32.mrb[3].mxu0 }
  0xfe   :  { %v223_v27 = vmul.f32 %v206_v15, %v185_v20  ;;  %v188_v29 = vadd.f32 %v2749_v14, %v187_v25 }
  0xff   :  { %v233_v30 = vadd.f32 %v229_v19, %v225_v22   ;;  %v226_v32 = vmul.f32 %v221_v26, %v196_v24 }
 0x100   :  { %v231_v34 = vadd.f32 %v227_v23, %v223_v27   ;;  %v224_v35 = vmul.f32 %v211_v31, %v188_v29 }
 0x101   :  { %v234_v36 = vadd.f32 %v230_v28, %v226_v32  }
 0x102   :  { %v232_v37 = vadd.f32 %v228_v33, %v224_v35  }
 0x103 LB: > { %s3801_s0 = smov 0   ;;  %s3559_s5 = sphi %s3784_s5, %s241_s5   ;;  %v3555_v34 = vphi %v231_v34, %v4338_v34   ;;  %v3551_v37 = vphi %v232_v37, %v4337_v37   ;;  %v3547_v30 = vphi %v233_v30, %v4336_v30   ;;  %v3543_v36 = vphi %v234_v36, %v4335_v36  }
 0x104 LB: >> { %vm260_vm1 = vcmask 261120   ;;  %s2858_s9 = sshll.u32 %s3579_s0, 6  ;;  %s4327_s6 = sld [smem:[#allocation14_spill]]  ;;  %vm3583_vm2 = vmmov 0   ;;  %vm605_vm3 = vcmask 64512   ;;  %vm714_vm4 = vcmask 130048   ;;  %s3579_s0 = sphi %s3801_s0, %s251_s0   ;;  %v3575_v34 = vphi %v3555_v34, %v4334_v34   ;;  %v3571_v37 = vphi %v3551_v37, %v4333_v37   ;;  %v3567_v30 = vphi %v3547_v30, %v4332_v30   ;;  %v3563_v36 = vphi %v3543_v36, %v4331_v36  }
 0x105   : >> { %v261_v38 = vsel %vm260_vm1, %v3575_v34, 0.0  ;;  %v267_v39 = vsel %vm260_vm1, %v3567_v30, 0.0  ;;  %v264_v40 = vsel %vm260_vm1, %v3571_v37, 0.0  ;;  %v270_v41 = vsel %vm260_vm1, %v3563_v36, 0.0  ;;  %s4328_s3 = sld [smem:[#allocation16_spill]]  ;;  %s4329_s4 = sld [smem:[#allocation15_spill]] }
 0x106   : >> { %262 = vadd.xlane.f32.xlu0 %v261_v38  ;;  %268 = vadd.xlane.f32.xlu1 %v267_v39  ;;  %s256_s2 = scalar_lea.vmem %s4295_s14, %s3579_s0  ;;  %s258_s27 = scalar_lea.vmem %s4296_s15, %s3579_s0  ;;  %vm2216_vm5 = vcmask 195584   ;;  %vm2516_vm6 = vcmask 523264  }
 0x107   : >> { %v2759_v18 = vld [vmem:[%s256_s2] ss:$0 sm:$0xff] }
 0x108   : >> { %v2760_v24 = vld [vmem:[%s258_s27] ss:$0 sm:$0xff] }
 0x10a   : >> { %265 = vadd.xlane.f32.xlu0 %v264_v40  ;;  %271 = vadd.xlane.f32.xlu1 %v270_v41  ;;  %s3838_s30 = scalar_lea.vmem %s4327_s6, %s2858_s9  ;;  %v3582_v41 = vmov 0.0  }
 0x10b   : >> { %s3843_s26 = scalar_lea.vmem %s4328_s3, %s2858_s9  ;;  %v3339_v62 = vld [vmem:[%s3838_s30] sm:$0xff]   ;;  %v3341_v0 = vld [vmem:[%s3838_s30 + $0x8] sm:$0xff]   ;;  %s3852_s28 = scalar_lea.vmem %s4329_s4, %s2858_s9 }
 0x10c   : >> { %v3340_v63 = vld [vmem:[%s3843_s26] sm:$0xff]   ;;  %2982 = vmatprep.subr.bf16.mxu1 %v3339_v62  ;;  %v3342_v1 = vld [vmem:[%s3843_s26 + $0x8] sm:$0xff]   ;;  %s2765_s3 = sshll.u32 %s3579_s0, 2  ;;  %s4330_s4 = sld [smem:[#allocation17_spill]] }
 0x10d   : >> { %2998 = vmatprep.subr.bf16.mxu0 %v3340_v63  ;;  %2983 = vmatpush3.bf16.msra.mxu1 %v3339_v62  ;;  %v3343_v2 = vld [vmem:[%s3852_s28] sm:$0xff]   ;;  %v3344_v40 = vld [vmem:[%s3852_s28 + $0x8] sm:$0xff]   ;;  %s396_s6 = scalar_lea.vmem %s4292_s11, %s2765_s3  ;;  %s394_s1 = scalar_lea.vmem %s4291_s10, %s2765_s3 }
 0x10e   : >> { %2999 = vmatpush3.bf16.msra.mxu0 %v3340_v63  ;;  %2984 = vmatprep.subr.bf16.mxu1 %v3341_v0 }
 0x10f   : >> { %3000 = vmatprep.subr.bf16.mxu0 %v3342_v1 }
 0x111   : >> { %2985 = vmatpush3.bf16.msra.mxu1 %v3341_v0 }
 0x112   : >> { %3001 = vmatpush3.bf16.msra.mxu0 %v3342_v1  ;;  %2990 = vmatprep.subr.bf16.mxu1 %v3343_v2  ;;  %s392_s9 = scalar_lea.vmem %s4330_s4, %s2765_s3  ;;  %v3905_v1 = vld [vmem:[%s394_s1] sm:$0xf]  ;;  %s2484_s3 = scalar_lea.vmem %s4302_s21, %s3579_s0 }
 0x113   : >> { %3012 = vmatprep.subr.bf16.mxu0 %v3582_v41 }
 0x193   : >> { %v263_v42 = vpop.xlane.xlu0 %262  ;;  %v269_v43 = vpop.xlane.xlu1 %268 }
 0x194   : >> { %v274_v44 = vmul.f32 0.03125, %v263_v42  ;;  %v276_v45 = vmul.f32 0.03125, %v269_v43  ;;  %v398_v42 = vlaneseq }
 0x196   : >> { %v278_v46 = vsub.f32 %v3575_v34, %v274_v44  ;;  %v280_v47 = vsub.f32 %v3567_v30, %v276_v45  ;;  %v3887_v43 = vshrl.u32 %v398_v42, 7  ;;  %v3896_v45 = vld [vmem:[%s392_s9] sm:$0xf]  ;;  %s3586_s9 = smov 24  }
 0x197   : >> { %v266_v48 = vpop.xlane.xlu0 %265  ;;  %v272_v49 = vpop.xlane.xlu1 %271 }
 0x198   : >> { %v275_v50 = vmul.f32 0.03125, %v266_v48  ;;  %v282_v51 = vmul.f32 %v278_v46, %v278_v46  ;;  %v277_v52 = vmul.f32 0.03125, %v272_v49  ;;  %v284_v53 = vmul.f32 %v280_v47, %v280_v47 }
 0x199   : >> { %v400_v44 = vsub.s32 0, %v3887_v43 }
 0x19a   : >> { %v279_v54 = vsub.f32 %v3571_v37, %v275_v50  ;;  %v286_v55 = vsel %vm260_vm1, %v282_v51, 0.0  ;;  %v281_v56 = vsub.f32 %v3563_v36, %v277_v52  ;;  %v292_v57 = vsel %vm260_vm1, %v284_v53, 0.0 }
 0x19b   : >> { %287 = vadd.xlane.f32.xlu0 %v286_v55 }
 0x19c   : >> { %v283_v58 = vmul.f32 %v279_v54, %v279_v54  ;;  %v285_v59 = vmul.f32 %v281_v56, %v281_v56 }
 0x19e   : >> { %v289_v60 = vsel %vm260_vm1, %v283_v58, 0.0  ;;  %v295_v61 = vsel %vm260_vm1, %v285_v59, 0.0 }
 0x19f   : >> { %293 = vadd.xlane.f32.xlu0 %v292_v57  ;;  %290 = vadd.xlane.f32.xlu1 %v289_v60 }
 0x1a3   : >> { %296 = vadd.xlane.f32.xlu1 %v295_v61 }
 0x228   : >> { %v288_v3 = vpop.xlane.xlu0 %287 }
 0x229   : >> { %v298_v4 = vmul.f32 0.03125, %v288_v3 }
 0x22b   : >> { %v302_v5 = vadd.f32 1e-05, %v298_v4 }
 0x22c   : >> { %v294_v6 = vpop.xlane.xlu0 %293  ;;  %v291_v7 = vpop.xlane.xlu1 %290 }
 0x22d   : >> { %3371 = vrsqrt.f32 %v302_v5  ;;  %v300_v8 = vmul.f32 0.03125, %v294_v6  ;;  %v299_v9 = vmul.f32 0.03125, %v291_v7  ;;  %v474_v6 = vrot.slane %v3905_v1, %v400_v44 }
 0x22f   : >> { %v304_v10 = vadd.f32 1e-05, %v300_v8  ;;  %v303_v11 = vadd.f32 1e-05, %v299_v9 }
 0x230   : >> { %v297_v13 = vpop.xlane.xlu1 %296 }
 0x231   : >> { %3373 = vrsqrt.f32 %v304_v10  ;;  %v301_v14 = vmul.f32 0.03125, %v297_v13 }
 0x232   : >> { %3375 = vrsqrt.f32 %v303_v11 }
 0x233   : >> { %v305_v15 = vadd.f32 1e-05, %v301_v14 }
 0x235   : >> { %3377 = vrsqrt.f32 %v305_v15 }
 0x237   : >> { %v3372_v16 = vpop.eup %3371 }
 0x238   : >> { %v310_v17 = vmul.f32 %v3372_v16, %v278_v46  ;;  %v3898_v46 = vld [vmem:[%s396_s6] sm:$0xf]  ;;  %s2229_s6 = scalar_lea.vmem %s4294_s13, %s3579_s0 }
 0x239   : >> { %v541_v48 = vrot.slane %v3898_v46, %v400_v44 }
 0x23a   : >> { %v320_v22 = vmul.f32 %v2759_v18, %v310_v17 }
 0x23b   : >> { %v3374_v19 = vpop.eup %3373 }
 0x23c   : >> { %v3376_v20 = vpop.eup %3375  ;;  %v312_v21 = vmul.f32 %v3374_v19, %v280_v47  ;;  %v330_v29 = vadd.f32 %v2760_v24, %v320_v22  ;;  %v401_v47 = vrot.slane %v3896_v45, %v400_v44 }
 0x23d   : >> { %v311_v23 = vmul.f32 %v3376_v20, %v279_v54 }
 0x23e   : >> { %v322_v27 = vmul.f32 %v2759_v18, %v312_v21 }
 0x23f   : >> { %v3378_v25 = vpop.eup %3377  ;;  %v321_v26 = vmul.f32 %v2759_v18, %v311_v23 }
 0x240   : >> { %v313_v28 = vmul.f32 %v3378_v25, %v281_v56  ;;  %v332_v35 = vadd.f32 %v2760_v24, %v322_v27 }
 0x241   : >> { %v331_v31 = vadd.f32 %v2760_v24, %v321_v26 }
 0x242   : >> { %v323_v32 = vmul.f32 %v2759_v18, %v313_v28 }
 0x243   : >> { %v3863_v33 = vpack.c.bf16 %v331_v31, %v330_v29 }
 0x244   : >> { %v333_v38 = vadd.f32 %v2760_v24, %v323_v32 }
 0x245   : >> { %2986 = vmatprep.mubr.msk.bf16.mxu1 %vm260_vm1, %v3863_v33  ;;  %3002 = vmatprep.mubr.msk.bf16.mxu0 %vm260_vm1, %v3863_v33 }
 0x246   : >> { %v3869_v39 = vpack.c.bf16 %v333_v38, %v332_v35 }
 0x248   : >> { %2987 = vmatmul.mubr.msk.bf16.vlgmr.msra.gmra.mrb[0].mxu1 %vm260_vm1, %v3869_v39  ;;  %3003 = vmatmul.mubr.msk.bf16.vlgmr.msra.gmra.mrb[0].mxu0 %vm260_vm1, %v3869_v39 }
 0x249   : >> { %2991 = vmatpush3.bf16.msra.mxu1 %v3343_v2  ;;  %2994 = vmatprep.mubr.msk.bf16.mxu1 %vm260_vm1, %v3863_v33 }
 0x24a   : >> { %2992 = vmatprep.subr.bf16.mxu1 %v3344_v40  ;;  %3014 = vmatprep.mubr.msk.bf16.mxu0 %vm3583_vm2, %v3582_v41 }
 0x24d   : >> { %2993 = vmatpush3.bf16.msra.mxu1 %v3344_v40 }
 0x24e   : >> { %3006 = vmatprep.subr.bf16.mxu1 %v3582_v41 }
 0x250   : >> { %2995 = vmatmul.mubr.msk.bf16.vlgmr.msra.gmra.mrb[4].mxu1 %vm260_vm1, %v3869_v39 }
 0x251   : >> { %3008 = vmatprep.mubr.msk.bf16.mxu1 %vm3583_vm2, %v3582_v41 }
 0x31b   : >> { %v2988_v49 = vpop.f32.mrb[0].mxu1  ;;  %v3004_v50 = vpop.f32.mrb[0].mxu0 }
 0x31c   : >> { %v454_v51 = vpop.f32.mrb[1].mxu1  ;;  %v588_v52 = vpop.f32.mrb[1].mxu0  ;;  %v463_v55 = vadd.f32 %v2988_v49, %v401_v47  ;;  %v597_v56 = vadd.f32 %v3004_v50, %v541_v48 }
 0x31d   : >> { %v2989_v53 = vpop.f32.mrb[2].mxu1  ;;  %v3005_v54 = vpop.f32.mrb[2].mxu0  ;;  %v455_v61 = vadd.f32 %v454_v51, %v401_v47  ;;  %v589_v62 = vadd.f32 %v588_v52, %v541_v48 }
 0x31e   : >> { %v466_v57 = vadd.f32 %v2989_v53, %v401_v47  ;;  %v600_v58 = vadd.f32 %v3005_v54, %v541_v48  ;;  %v457_v59 = vpop.f32.mrb[3].mxu1  ;;  %v591_v60 = vpop.f32.mrb[3].mxu0 }
 0x31f   : >> { %v458_v63 = vadd.f32 %v457_v59, %v401_v47  ;;  %v592_v0 = vadd.f32 %v591_v60, %v541_v48 }
 0x320   : >> { %v470_v2 = vpack.c.bf16 %v466_v57, %v463_v55  ;;  %v604_v3 = vpack.c.bf16 %v600_v58, %v597_v56 }
 0x321   : >> { %v469_v4 = vpack.c.bf16 %v458_v63, %v455_v61  ;;  %v603_v5 = vpack.c.bf16 %v592_v0, %v589_v62 }
 0x323   : >> { %v2996_v7 = vpop.f32.mrb[4].mxu1 }
 0x324   : >> { %v521_v8 = vpop.f32.mrb[5].mxu1  ;;  %v530_v10 = vadd.f32 %v2996_v7, %v474_v6  ;;  %v3345_v7 = vld [vmem:[%s3852_s28 + $0x10] sm:$0xff]  }
 0x325   : >> { %v2997_v9 = vpop.f32.mrb[6].mxu1  ;;  %v522_v14 = vadd.f32 %v521_v8, %v474_v6  ;;  %v3346_v8 = vld [vmem:[%s3838_s30 + $0x10] sm:$0xff]  }
 0x326   : >> { %v533_v11 = vadd.f32 %v2997_v9, %v474_v6  ;;  %v524_v13 = vpop.f32.mrb[7].mxu1 }
 0x327   : >> { %v525_v15 = vadd.f32 %v524_v13, %v474_v6 }
 0x328   : >> { %v537_v16 = vpack.c.bf16 %v533_v11, %v530_v10 }
 0x329   : >> { %v536_v17 = vpack.c.bf16 %v525_v15, %v522_v14 }
 0x32a   : >> { %v657_v18 = vsel %vm605_vm3, %v537_v16, 0 }
 0x32b   : >> { %3013 = vmatpush3.bf16.xpose.msra.mxu0 %v657_v18  ;;  %v610_v19 = vsel %vm605_vm3, %v536_v17, 0 }
 0x32c   : >> { %3007 = vmatpush3.bf16.xpose.msra.mxu1 %v610_v19  ;;  %3024 = vmatprep.subr.bf16.mxu0 %v3582_v41 }
 0x32d   : >> { %3018 = vmatprep.subr.bf16.mxu1 %v3582_v41 }
 0x332   : >> { %3015 = vmatmul.mubr.msk.bf16.vlgmr.msra.gmra.mrb[4].mxu0 %vm605_vm3, %v470_v2 }
 0x333   : >> { %3009 = vmatmul.mubr.msk.bf16.vlgmr.msra.gmra.mrb[8].mxu1 %vm605_vm3, %v469_v4  ;;  %3025 = vmatpush3.bf16.msra.mxu0 %v604_v3 }
 0x334   : >> { %3019 = vmatpush3.bf16.msra.mxu1 %v603_v5  ;;  %3026 = vmatprep.mubr.msk.bf16.mxu0 %vm3583_vm2, %v3582_v41 }
 0x335   : >> { %3020 = vmatprep.mubr.msk.bf16.mxu1 %vm3583_vm2, %v3582_v41  ;;  %3038 = vmatprep.subr.bf16.mxu0 %v3345_v7 }
 0x336   : >> { %3030 = vmatprep.subr.bf16.mxu1 %v3346_v8 }
 0x405   : >> { %v693_v20 = vpop.f32.mrb[4].mxu0 }
 0x406   : >> { %v702_v21 = vmul.f32 0.35355338, %v693_v20  ;;  %v646_v22 = vpop.f32.mrb[8].mxu1  ;;  %v3016_v23 = vpop.f32.mrb[5].mxu0  ;;  %v3347_v20 = vld [vmem:[%s3852_s28 + $0x18] sm:$0xff]  }
 0x407   : >> { %v700_v24 = vmul.f32 0.35355338, %v646_v22  ;;  %v3010_v25 = vpop.f32.mrb[9].mxu1  ;;  %v696_v26 = vpop.f32.mrb[6].mxu0 }
 0x408   : >> { %v712_v27 = vadd.f32 %v3759_v12, %v702_v21  ;;  %v703_v28 = vmul.f32 0.35355338, %v696_v26  ;;  %v649_v29 = vpop.f32.mrb[10].mxu1  ;;  %v3017_v31 = vpop.f32.mrb[7].mxu0  ;;  %v3348_v25 = vld [vmem:[%s3838_s30 + $0x18] sm:$0xff]   ;;  %v3349_v26 = vld [vmem:[%s3843_s26 + $0x10] sm:$0xff]  }
 0x409   : >> { %v701_v32 = vmul.f32 0.35355338, %v649_v29  ;;  %v3011_v35 = vpop.f32.mrb[11].mxu1  ;;  %v710_v38 = vadd.f32 %v3759_v12, %v700_v24 }
 0x40a   : >> { %v713_v40 = vadd.f32 %v3759_v12, %v703_v28  ;;  %v721_v42 = vsel %vm714_vm4, %v712_v27, -inf }
 0x40b   : >> { %722 = vmax.xlane.f32.xlu0 %v721_v42  ;;  %v711_v44 = vadd.f32 %v3759_v12, %v701_v32  ;;  %v715_v48 = vsel %vm714_vm4, %v710_v38, -inf }
 0x40c   : >> { %v724_v47 = vsel %vm714_vm4, %v713_v40, -inf }
 0x40d   : >> { %725 = vmax.xlane.f32.xlu1 %v724_v47  ;;  %v718_v49 = vsel %vm714_vm4, %v711_v44, -inf }
 0x40f   : >> { %716 = vmax.xlane.f32.xlu0 %v715_v48 }
 0x411   : >> { %719 = vmax.xlane.f32.xlu1 %v718_v49 }
 0x498   : >> { %v723_v50 = vpop.xlane.xlu0 %722 }
 0x499   : >> { %v729_v51 = vsub.f32 %v712_v27, %v723_v50  ;;  %v3350_v27 = vld [vmem:[%s3843_s26 + $0x18] sm:$0xff]  }
 0x49a   : >> { %v726_v52 = vpop.xlane.xlu1 %725 }
 0x49b   : >> { %v735_v53 = vmul.f32 1.442695, %v729_v51  ;;  %v730_v54 = vsub.f32 %v713_v40, %v726_v52 }
 0x49c   : >> { %v717_v55 = vpop.xlane.xlu0 %716 }
 0x49d   : >> { %3379 = vpow2.f32 %v735_v53  ;;  %v737_v56 = vmul.f32 1.442695, %v730_v54  ;;  %v727_v57 = vsub.f32 %v710_v38, %v717_v55  ;;  %v851_v38 = vsub.s32 1, %v3887_v43 }
 0x49e   : >> { %v720_v58 = vpop.xlane.xlu1 %719 }
 0x49f   : >> { %3381 = vpow2.f32 %v737_v56  ;;  %v731_v59 = vmul.f32 1.442695, %v727_v57  ;;  %v728_v60 = vsub.f32 %v711_v44, %v720_v58  ;;  %v919_v47 = vrot.slane %v3905_v1, %v851_v38 }
 0x4a0   : >> { %v852_v51 = vrot.slane %v3896_v45, %v851_v38 }
 0x4a1   : >> { %3383 = vpow2.f32 %v731_v59  ;;  %v733_v61 = vmul.f32 1.442695, %v728_v60 }
 0x4a3   : >> { %3385 = vpow2.f32 %v733_v61 }
 0x4a7   : >> { %v3380_v62 = vpop.eup %3379 }
 0x4a8   : >> { %v745_v63 = vsel %vm714_vm4, %v3380_v62, 0.0 }
 0x4a9   : >> { %v3382_v0 = vpop.eup %3381  ;;  %746 = vadd.xlane.f32.xlu0 %v745_v63 }
 0x4aa   : >> { %v748_v2 = vsel %vm714_vm4, %v3382_v0, 0.0 }
 0x4ab   : >> { %v3384_v3 = vpop.eup %3383  ;;  %749 = vadd.xlane.f32.xlu1 %v748_v2 }
 0x4ac   : >> { %v739_v4 = vsel %vm714_vm4, %v3384_v3, 0.0 }
 0x4ad   : >> { %v3386_v5 = vpop.eup %3385  ;;  %740 = vadd.xlane.f32.xlu0 %v739_v4 }
 0x4ae   : >> { %v742_v6 = vsel %vm714_vm4, %v3386_v5, 0.0 }
 0x4af   : >> { %743 = vadd.xlane.f32.xlu1 %v742_v6 }
 0x536   : >> { %v747_v9 = vpop.xlane.xlu0 %746 }
 0x537   : >> { %3387 = vrcp.f32 %v747_v9 }
 0x538   : >> { %v750_v10 = vpop.xlane.xlu1 %749 }
 0x539   : >> { %3389 = vrcp.f32 %v750_v10 }
 0x53a   : >> { %v741_v11 = vpop.xlane.xlu0 %740 }
 0x53b   : >> { %3391 = vrcp.f32 %v741_v11 }
 0x53c   : >> { %v744_v13 = vpop.xlane.xlu1 %743 }
 0x53d   : >> { %3393 = vrcp.f32 %v744_v13 }
 0x541   : >> { %v3388_v14 = vpop.eup %3387 }
 0x542   : >> { %v757_v16 = vmul.f32 %v3388_v14, %v3380_v62 }
 0x543   : >> { %v3390_v15 = vpop.eup %3389 }
 0x544   : >> { %v758_v17 = vmul.f32 %v3390_v15, %v3382_v0 }
 0x545   : >> { %v3392_v18 = vpop.eup %3391 }
 0x546   : >> { %v760_v19 = vpack.c.bf16 %v758_v17, %v757_v16  ;;  %v755_v22 = vmul.f32 %v3392_v18, %v3384_v3 }
 0x547   : >> { %v3394_v21 = vpop.eup %3393 }
 0x548   : >> { %v756_v23 = vmul.f32 %v3394_v21, %v3386_v5  ;;  %3027 = vmatmul.mubr.msk.bf16.vlgmr.msra.gmra.mrb[8].mxu0 %vm714_vm4, %v760_v19 }
 0x549   : >> { %3039 = vmatpush3.bf16.msra.mxu0 %v3345_v7  ;;  %3042 = vmatprep.mubr.msk.bf16.mxu0 %vm260_vm1, %v3863_v33 }
 0x54a   : >> { %v759_v24 = vpack.c.bf16 %v756_v23, %v755_v22  ;;  %3040 = vmatprep.subr.bf16.mxu0 %v3347_v20 }
 0x54c   : >> { %3021 = vmatmul.mubr.msk.bf16.vlgmr.msra.gmra.mrb[12].mxu1 %vm714_vm4, %v759_v24 }
 0x54d   : >> { %3031 = vmatpush3.bf16.msra.mxu1 %v3346_v8  ;;  %3034 = vmatprep.mubr.msk.bf16.mxu1 %vm260_vm1, %v3863_v33  ;;  %v986_v8 = vrot.slane %v3898_v46, %v851_v38 }
 0x54e   : >> { %3041 = vmatpush3.bf16.msra.mxu0 %v3347_v20  ;;  %3032 = vmatprep.subr.bf16.mxu1 %v3348_v25 }
 0x54f   : >> { %3054 = vmatprep.subr.bf16.mxu0 %v3582_v41 }
 0x551   : >> { %3043 = vmatmul.mubr.msk.bf16.vlgmr.msra.gmra.mrb[12].mxu0 %vm260_vm1, %v3869_v39  ;;  %3033 = vmatpush3.bf16.msra.mxu1 %v3348_v25 }
 0x552   : >> { %3046 = vmatprep.subr.bf16.mxu1 %v3349_v26  ;;  %3056 = vmatprep.mubr.msk.bf16.mxu0 %vm3583_vm2, %v3582_v41 }
 0x554   : >> { %3035 = vmatmul.mubr.msk.bf16.vlgmr.msra.gmra.mrb[16].mxu1 %vm260_vm1, %v3869_v39 }
 0x555   : >> { %3047 = vmatpush3.bf16.msra.mxu1 %v3349_v26  ;;  %3050 = vmatprep.mubr.msk.bf16.mxu1 %vm260_vm1, %v3863_v33 }
 0x556   : >> { %3048 = vmatprep.subr.bf16.mxu1 %v3350_v27 }
 0x559   : >> { %3049 = vmatpush3.bf16.msra.mxu1 %v3350_v27 }
 0x55a   : >> { %3060 = vmatprep.subr.bf16.mxu1 %v3582_v41 }
 0x55c   : >> { %3051 = vmatmul.mubr.msk.bf16.vlgmr.msra.gmra.mrb[20].mxu1 %vm260_vm1, %v3869_v39 }
 0x55d   : >> { %3062 = vmatprep.mubr.msk.bf16.mxu1 %vm3583_vm2, %v3582_v41 }
 0x61b   : >> { %v3956_v28 = vpop.f32.mrb[8].mxu0 }
 0x61c   : >> { %v3028_v29 = vpop.f32.mrb[9].mxu0 }
 0x61d   : >> { %v3958_v31 = vpop.f32.mrb[10].mxu0 }
 0x61e   : >> { %v3029_v32 = vpop.f32.mrb[11].mxu0 }
 0x61f   : >> { %v3960_v35 = vpop.f32.mrb[12].mxu1 }
 0x620   : >> { %v3022_v40 = vpop.f32.mrb[13].mxu1 }
 0x621   : >> { %v3963_v42 = vpop.f32.mrb[14].mxu1 }
 0x622   : >> { %v3023_v44 = vpop.f32.mrb[15].mxu1 }
 0x624   : >> { %v3044_v48 = vpop.f32.mrb[12].mxu0 }
 0x625   : >> { %v966_v49 = vpop.f32.mrb[13].mxu0  ;;  %v975_v52 = vadd.f32 %v3044_v48, %v919_v47 }
 0x626   : >> { %v3045_v50 = vpop.f32.mrb[14].mxu0  ;;  %v967_v56 = vadd.f32 %v966_v49, %v919_v47 }
 0x627   : >> { %v978_v53 = vadd.f32 %v3045_v50, %v919_v47  ;;  %v969_v54 = vpop.f32.mrb[15].mxu0  ;;  %v3036_v55 = vpop.f32.mrb[16].mxu1 }
 0x628   : >> { %v970_v57 = vadd.f32 %v969_v54, %v919_v47  ;;  %v899_v58 = vpop.f32.mrb[17].mxu1  ;;  %v908_v62 = vadd.f32 %v3036_v55, %v852_v51 }
 0x629   : >> { %v982_v59 = vpack.c.bf16 %v978_v53, %v975_v52  ;;  %v3037_v60 = vpop.f32.mrb[18].mxu1  ;;  %v900_v2 = vadd.f32 %v899_v58, %v852_v51 }
 0x62a   : >> { %v981_v61 = vpack.c.bf16 %v970_v57, %v967_v56  ;;  %v911_v63 = vadd.f32 %v3037_v60, %v852_v51  ;;  %v902_v0 = vpop.f32.mrb[19].mxu1 }
 0x62b   : >> { %v903_v3 = vadd.f32 %v902_v0, %v852_v51  ;;  %v1101_v4 = vsel %vm605_vm3, %v982_v59, 0 }
 0x62c   : >> { %v915_v5 = vpack.c.bf16 %v911_v63, %v908_v62  ;;  %3061 = vmatpush3.bf16.xpose.msra.mxu1 %v1101_v4  ;;  %v1054_v6 = vsel %vm605_vm3, %v981_v61, 0 }
 0x62d   : >> { %v914_v7 = vpack.c.bf16 %v903_v3, %v900_v2  ;;  %3055 = vmatpush3.bf16.xpose.msra.mxu0 %v1054_v6  ;;  %3072 = vmatprep.subr.bf16.mxu1 %v3582_v41 }
 0x62e   : >> { %3066 = vmatprep.subr.bf16.mxu0 %v3582_v41 }
 0x62f   : >> { %v3052_v9 = vpop.f32.mrb[20].mxu1 }
 0x630   : >> { %v1033_v10 = vpop.f32.mrb[21].mxu1  ;;  %v1042_v13 = vadd.f32 %v3052_v9, %v986_v8 }
 0x631   : >> { %v3053_v11 = vpop.f32.mrb[22].mxu1  ;;  %v1034_v16 = vadd.f32 %v1033_v10, %v986_v8 }
 0x632   : >> { %v1045_v14 = vadd.f32 %v3053_v11, %v986_v8  ;;  %v1036_v15 = vpop.f32.mrb[23].mxu1  ;;  %v3351_v11 = vld [vmem:[%s3852_s28 + $0x20] sm:$0xff]  }
 0x633   : >> { %v1037_v17 = vadd.f32 %v1036_v15, %v986_v8  ;;  %3063 = vmatmul.mubr.msk.bf16.vlgmr.msra.gmra.mrb[24].mxu1 %vm605_vm3, %v915_v5 }
 0x634   : >> { %v1049_v18 = vpack.c.bf16 %v1045_v14, %v1042_v13  ;;  %3057 = vmatmul.mubr.msk.bf16.vlgmr.msra.gmra.mrb[16].mxu0 %vm605_vm3, %v914_v7  ;;  %3074 = vmatprep.mubr.msk.bf16.mxu1 %vm3583_vm2, %v3582_v41  ;;  %v3352_v13 = vld [vmem:[%s3838_s30 + $0x20] sm:$0xff]  }
 0x635   : >> { %v1048_v19 = vpack.c.bf16 %v1037_v17, %v1034_v16  ;;  %3068 = vmatprep.mubr.msk.bf16.mxu0 %vm3583_vm2, %v3582_v41 }
 0x636   : >> { %3073 = vmatpush3.bf16.msra.mxu1 %v1049_v18 }
 0x637   : >> { %3067 = vmatpush3.bf16.msra.mxu0 %v1048_v19  ;;  %3086 = vmatprep.subr.bf16.mxu1 %v3351_v11 }
 0x638   : >> { %3078 = vmatprep.subr.bf16.mxu0 %v3352_v13 }
 0x706   : >> { %v1137_v20 = vpop.f32.mrb[24].mxu1 }
 0x707   : >> { %v1146_v21 = vmul.f32 0.35355338, %v1137_v20  ;;  %v1090_v22 = vpop.f32.mrb[16].mxu0  ;;  %v3064_v23 = vpop.f32.mrb[25].mxu1 }
 0x708   : >> { %v1144_v24 = vmul.f32 0.35355338, %v1090_v22  ;;  %v3058_v25 = vpop.f32.mrb[17].mxu0  ;;  %v1140_v26 = vpop.f32.mrb[26].mxu1 }
 0x709   : >> { %v1150_v27 = vadd.f32 %v3759_v12, %v1146_v21  ;;  %v1147_v29 = vmul.f32 0.35355338, %v1140_v26  ;;  %v1093_v32 = vpop.f32.mrb[18].mxu0  ;;  %v3065_v38 = vpop.f32.mrb[27].mxu1 }
 0x70a   : >> { %v1145_v40 = vmul.f32 0.35355338, %v1093_v32  ;;  %v3059_v44 = vpop.f32.mrb[19].mxu0  ;;  %v1148_v47 = vadd.f32 %v3759_v12, %v1144_v24  ;;  %v3353_v24 = vld [vmem:[%s3852_s28 + $0x28] sm:$0xff]   ;;  %v3355_v38 = vld [vmem:[%s3843_s26 + $0x20] sm:$0xff]  }
 0x70b   : >> { %v1151_v48 = vadd.f32 %v3759_v12, %v1147_v29  ;;  %v1158_v49 = vsel %vm714_vm4, %v1150_v27, -inf  ;;  %v3354_v32 = vld [vmem:[%s3838_s30 + $0x28] sm:$0xff]  }
 0x70c   : >> { %1159 = vmax.xlane.f32.xlu0 %v1158_v49  ;;  %v1149_v50 = vadd.f32 %v3759_v12, %v1145_v40  ;;  %v1152_v52 = vsel %vm714_vm4, %v1148_v47, -inf  ;;  %v3356_v40 = vld [vmem:[%s3843_s26 + $0x28] sm:$0xff]  }
 0x70d   : >> { %v1161_v51 = vsel %vm714_vm4, %v1151_v48, -inf }
 0x70e   : >> { %1162 = vmax.xlane.f32.xlu1 %v1161_v51  ;;  %v1155_v53 = vsel %vm714_vm4, %v1149_v50, -inf }
 0x710   : >> { %1153 = vmax.xlane.f32.xlu0 %v1152_v52  ;;  %v1288_v52 = vsub.s32 2, %v3887_v43 }
 0x712   : >> { %1156 = vmax.xlane.f32.xlu1 %v1155_v53 }
 0x799   : >> { %v1160_v54 = vpop.xlane.xlu0 %1159 }
 0x79a   : >> { %v1166_v55 = vsub.f32 %v1150_v27, %v1160_v54 }
 0x79b   : >> { %v1163_v56 = vpop.xlane.xlu1 %1162 }
 0x79c   : >> { %v1172_v57 = vmul.f32 1.442695, %v1166_v55  ;;  %v1167_v58 = vsub.f32 %v1151_v48, %v1163_v56 }
 0x79d   : >> { %v1154_v59 = vpop.xlane.xlu0 %1153 }
 0x79e   : >> { %3395 = vpow2.f32 %v1172_v57  ;;  %v1174_v60 = vmul.f32 1.442695, %v1167_v58  ;;  %v1164_v61 = vsub.f32 %v1148_v47, %v1154_v59  ;;  %v1356_v57 = vrot.slane %v3905_v1, %v1288_v52 }
 0x79f   : >> { %v1157_v62 = vpop.xlane.xlu1 %1156 }
 0x7a0   : >> { %3397 = vpow2.f32 %v1174_v60  ;;  %v1168_v63 = vmul.f32 1.442695, %v1164_v61  ;;  %v1165_v0 = vsub.f32 %v1149_v50, %v1157_v62  ;;  %v1289_v61 = vrot.slane %v3896_v45, %v1288_v52 }
 0x7a2   : >> { %3399 = vpow2.f32 %v1168_v63  ;;  %v1170_v2 = vmul.f32 1.442695, %v1165_v0 }
 0x7a4   : >> { %3401 = vpow2.f32 %v1170_v2 }
 0x7a8   : >> { %v3396_v3 = vpop.eup %3395 }
 0x7a9   : >> { %v1182_v4 = vsel %vm714_vm4, %v3396_v3, 0.0 }
 0x7aa   : >> { %v3398_v5 = vpop.eup %3397  ;;  %1183 = vadd.xlane.f32.xlu0 %v1182_v4 }
 0x7ab   : >> { %v1185_v6 = vsel %vm714_vm4, %v3398_v5, 0.0 }
 0x7ac   : >> { %v3400_v7 = vpop.eup %3399  ;;  %1186 = vadd.xlane.f32.xlu1 %v1185_v6 }
 0x7ad   : >> { %v1176_v8 = vsel %vm714_vm4, %v3400_v7, 0.0 }
 0x7ae   : >> { %v3402_v9 = vpop.eup %3401  ;;  %1177 = vadd.xlane.f32.xlu0 %v1176_v8 }
 0x7af   : >> { %v1179_v10 = vsel %vm714_vm4, %v3402_v9, 0.0 }
 0x7b0   : >> { %1180 = vadd.xlane.f32.xlu1 %v1179_v10 }
 0x837   : >> { %v1184_v14 = vpop.xlane.xlu0 %1183 }
 0x838   : >> { %3403 = vrcp.f32 %v1184_v14 }
 0x839   : >> { %v1187_v15 = vpop.xlane.xlu1 %1186 }
 0x83a   : >> { %3405 = vrcp.f32 %v1187_v15 }
 0x83b   : >> { %v1178_v16 = vpop.xlane.xlu0 %1177 }
 0x83c   : >> { %3407 = vrcp.f32 %v1178_v16 }
 0x83d   : >> { %v1181_v17 = vpop.xlane.xlu1 %1180 }
 0x83e   : >> { %3409 = vrcp.f32 %v1181_v17 }
 0x842   : >> { %v3404_v18 = vpop.eup %3403 }
 0x843   : >> { %v1194_v20 = vmul.f32 %v3404_v18, %v3396_v3 }
 0x844   : >> { %v3406_v19 = vpop.eup %3405 }
 0x845   : >> { %v1195_v21 = vmul.f32 %v3406_v19, %v3398_v5  ;;  %v1423_v19 = vrot.slane %v3898_v46, %v1288_v52 }
 0x846   : >> { %v3408_v22 = vpop.eup %3407 }
 0x847   : >> { %v1197_v23 = vpack.c.bf16 %v1195_v21, %v1194_v20  ;;  %v1192_v26 = vmul.f32 %v3408_v22, %v3400_v7 }
 0x848   : >> { %v3410_v25 = vpop.eup %3409 }
 0x849   : >> { %v1193_v27 = vmul.f32 %v3410_v25, %v3402_v9  ;;  %3075 = vmatmul.mubr.msk.bf16.vlgmr.msra.gmra.mrb[28].mxu1 %vm714_vm4, %v1197_v23 }
 0x84a   : >> { %3087 = vmatpush3.bf16.msra.mxu1 %v3351_v11  ;;  %3090 = vmatprep.mubr.msk.bf16.mxu1 %vm260_vm1, %v3863_v33 }
 0x84b   : >> { %v1196_v29 = vpack.c.bf16 %v1193_v27, %v1192_v26  ;;  %3088 = vmatprep.subr.bf16.mxu1 %v3353_v24 }
 0x84d   : >> { %3069 = vmatmul.mubr.msk.bf16.vlgmr.msra.gmra.mrb[20].mxu0 %vm714_vm4, %v1196_v29 }
 0x84e   : >> { %3079 = vmatpush3.bf16.msra.mxu0 %v3352_v13  ;;  %3082 = vmatprep.mubr.msk.bf16.mxu0 %vm260_vm1, %v3863_v33 }
 0x84f   : >> { %3089 = vmatpush3.bf16.msra.mxu1 %v3353_v24  ;;  %3080 = vmatprep.subr.bf16.mxu0 %v3354_v32 }
 0x850   : >> { %3102 = vmatprep.subr.bf16.mxu1 %v3582_v41 }
 0x852   : >> { %3091 = vmatmul.mubr.msk.bf16.vlgmr.msra.gmra.mrb[32].mxu1 %vm260_vm1, %v3869_v39  ;;  %3081 = vmatpush3.bf16.msra.mxu0 %v3354_v32 }
 0x853   : >> { %3094 = vmatprep.subr.bf16.mxu0 %v3355_v38  ;;  %3104 = vmatprep.mubr.msk.bf16.mxu1 %vm3583_vm2, %v3582_v41 }
 0x855   : >> { %3083 = vmatmul.mubr.msk.bf16.vlgmr.msra.gmra.mrb[24].mxu0 %vm260_vm1, %v3869_v39 }
 0x856   : >> { %3095 = vmatpush3.bf16.msra.mxu0 %v3355_v38  ;;  %3098 = vmatprep.mubr.msk.bf16.mxu0 %vm260_vm1, %v3863_v33 }
 0x857   : >> { %3096 = vmatprep.subr.bf16.mxu0 %v3356_v40 }
 0x85a   : >> { %3097 = vmatpush3.bf16.msra.mxu0 %v3356_v40 }
 0x85b   : >> { %3108 = vmatprep.subr.bf16.mxu0 %v3582_v41 }
 0x85d   : >> { %3099 = vmatmul.mubr.msk.bf16.vlgmr.msra.gmra.mrb[28].mxu0 %vm260_vm1, %v3869_v39 }
 0x85e   : >> { %3110 = vmatprep.mubr.msk.bf16.mxu0 %vm3583_vm2, %v3582_v41 }
 0x91c   : >> { %v4016_v44 = vpop.f32.mrb[28].mxu1 }
 0x91d   : >> { %v3076_v47 = vpop.f32.mrb[29].mxu1 }
 0x91e   : >> { %v4018_v48 = vpop.f32.mrb[30].mxu1 }
 0x91f   : >> { %v3314_v49 = vpack.i.bf16 %v4018_v48, %v4016_v44  ;;  %v3077_v50 = vpop.f32.mrb[31].mxu1 }
 0x920   : >> { %v4022_v51 = vpop.f32.mrb[20].mxu0 }
 0x921   : >> { %v3070_v53 = vpop.f32.mrb[21].mxu0 }
 0x922   : >> { %v4025_v54 = vpop.f32.mrb[22].mxu0 }
 0x923   : >> { %v3309_v55 = vpack.i.bf16 %v4025_v54, %v4022_v51  ;;  %v3071_v56 = vpop.f32.mrb[23].mxu0 }
 0x925   : >> { %v3092_v58 = vpop.f32.mrb[32].mxu1 }
 0x926   : >> { %v1403_v59 = vpop.f32.mrb[33].mxu1  ;;  %v1412_v62 = vadd.f32 %v3092_v58, %v1356_v57 }
 0x927   : >> { %v3093_v60 = vpop.f32.mrb[34].mxu1  ;;  %v1404_v3 = vadd.f32 %v1403_v59, %v1356_v57 }
 0x928   : >> { %v1415_v63 = vadd.f32 %v3093_v60, %v1356_v57  ;;  %v1406_v0 = vpop.f32.mrb[35].mxu1  ;;  %v3084_v2 = vpop.f32.mrb[24].mxu0 }
 0x929   : >> { %v1407_v4 = vadd.f32 %v1406_v0, %v1356_v57  ;;  %v1336_v5 = vpop.f32.mrb[25].mxu0  ;;  %v1345_v9 = vadd.f32 %v3084_v2, %v1289_v61 }
 0x92a   : >> { %v1419_v6 = vpack.c.bf16 %v1415_v63, %v1412_v62  ;;  %v3085_v7 = vpop.f32.mrb[26].mxu0  ;;  %v1337_v13 = vadd.f32 %v1336_v5, %v1289_v61 }
 0x92b   : >> { %v1418_v8 = vpack.c.bf16 %v1407_v4, %v1404_v3  ;;  %v1348_v10 = vadd.f32 %v3085_v7, %v1289_v61  ;;  %v1339_v11 = vpop.f32.mrb[27].mxu0 }
 0x92c   : >> { %v1340_v14 = vadd.f32 %v1339_v11, %v1289_v61  ;;  %v1538_v15 = vsel %vm605_vm3, %v1419_v6, 0 }
 0x92d   : >> { %v1352_v16 = vpack.c.bf16 %v1348_v10, %v1345_v9  ;;  %3109 = vmatpush3.bf16.xpose.msra.mxu0 %v1538_v15  ;;  %v1491_v17 = vsel %vm605_vm3, %v1418_v8, 0 }
 0x92e   : >> { %v1351_v18 = vpack.c.bf16 %v1340_v14, %v1337_v13  ;;  %3103 = vmatpush3.bf16.xpose.msra.mxu1 %v1491_v17  ;;  %3120 = vmatprep.subr.bf16.mxu0 %v3582_v41 }
 0x92f   : >> { %3114 = vmatprep.subr.bf16.mxu1 %v3582_v41 }
 0x930   : >> { %v3100_v20 = vpop.f32.mrb[28].mxu0 }
 0x931   : >> { %v1470_v21 = vpop.f32.mrb[29].mxu0  ;;  %v1479_v23 = vadd.f32 %v3100_v20, %v1423_v19 }
 0x932   : >> { %v3101_v22 = vpop.f32.mrb[30].mxu0  ;;  %v1471_v26 = vadd.f32 %v1470_v21, %v1423_v19 }
 0x933   : >> { %v1482_v24 = vadd.f32 %v3101_v22, %v1423_v19  ;;  %v1473_v25 = vpop.f32.mrb[31].mxu0 }
 0x934   : >> { %v1474_v27 = vadd.f32 %v1473_v25, %v1423_v19  ;;  %3111 = vmatmul.mubr.msk.bf16.vlgmr.msra.gmra.mrb[32].mxu0 %vm605_vm3, %v1352_v16 }
 0x935   : >> { %v1486_v29 = vpack.c.bf16 %v1482_v24, %v1479_v23  ;;  %3105 = vmatmul.mubr.msk.bf16.vlgmr.msra.gmra.mrb[36].mxu1 %vm605_vm3, %v1351_v18  ;;  %3122 = vmatprep.mubr.msk.bf16.mxu0 %vm3583_vm2, %v3582_v41 }
 0x936   : >> { %v1485_v32 = vpack.c.bf16 %v1474_v27, %v1471_v26  ;;  %3116 = vmatprep.mubr.msk.bf16.mxu1 %vm3583_vm2, %v3582_v41 }
 0x937   : >> { %3121 = vmatpush3.bf16.msra.mxu0 %v1486_v29  ;;  %v3357_v29 = vld [vmem:[%s3852_s28 + $0x30] sm:$0xff]  }
 0x938   : >> { %3115 = vmatpush3.bf16.msra.mxu1 %v1485_v32  ;;  %3134 = vmatprep.subr.bf16.mxu0 %v3357_v29  ;;  %v3358_v32 = vld [vmem:[%s3838_s30 + $0x30] sm:$0xff]  }
 0x939   : >> { %3126 = vmatprep.subr.bf16.mxu1 %v3358_v32 }
 0xa07   : >> { %v1574_v38 = vpop.f32.mrb[32].mxu0 }
 0xa08   : >> { %v1583_v40 = vmul.f32 0.35355338, %v1574_v38  ;;  %v1527_v47 = vpop.f32.mrb[36].mxu1  ;;  %v3112_v50 = vpop.f32.mrb[33].mxu0 }
 0xa09   : >> { %v1581_v52 = vmul.f32 0.35355338, %v1527_v47  ;;  %v3106_v53 = vpop.f32.mrb[37].mxu1  ;;  %v1577_v56 = vpop.f32.mrb[34].mxu0 }
 0xa0a   : >> { %v1587_v57 = vadd.f32 %v3759_v12, %v1583_v40  ;;  %v1584_v58 = vmul.f32 0.35355338, %v1577_v56  ;;  %v1530_v59 = vpop.f32.mrb[38].mxu1  ;;  %v3113_v60 = vpop.f32.mrb[35].mxu0 }
 0xa0b   : >> { %v1582_v61 = vmul.f32 0.35355338, %v1530_v59  ;;  %v3107_v62 = vpop.f32.mrb[39].mxu1  ;;  %v1585_v63 = vadd.f32 %v3759_v12, %v1581_v52  ;;  %v3359_v60 = vld [vmem:[%s3852_s28 + $0x38] sm:$0xff]   ;;  %s2861_s28 = sshll.u32 %s3579_s0, 4 }
 0xa0c   : >> { %v1588_v0 = vadd.f32 %v3759_v12, %v1584_v58  ;;  %v1595_v2 = vsel %vm714_vm4, %v1587_v57, -inf  ;;  %s2224_s4 = scalar_lea.vmem %s4293_s12, %s2861_s28  ;;  %s2387_s1 = scalar_lea.vmem %s4299_s18, %s2861_s28 }
 0xa0d   : >> { %1596 = vmax.xlane.f32.xlu0 %v1595_v2  ;;  %v1586_v3 = vadd.f32 %v3759_v12, %v1582_v61  ;;  %v1589_v5 = vsel %vm714_vm4, %v1585_v63, -inf  ;;  %v3360_v2 = vld [vmem:[%s3838_s30 + $0x38] sm:$0xff]   ;;  %s3584_s30 = smov 8  }
 0xa0e   : >> { %v1598_v4 = vsel %vm714_vm4, %v1588_v0, -inf }
 0xa0f   : >> { %1599 = vmax.xlane.f32.xlu1 %v1598_v4  ;;  %v1592_v6 = vsel %vm714_vm4, %v1586_v3, -inf  ;;  %v3362_v4 = vld [vmem:[%s3843_s26 + $0x38] sm:$0xff]  }
 0xa11   : >> { %1590 = vmax.xlane.f32.xlu0 %v1589_v5 }
 0xa13   : >> { %1593 = vmax.xlane.f32.xlu1 %v1592_v6 }
 0xa9a   : >> { %v1597_v7 = vpop.xlane.xlu0 %1596 }
 0xa9b   : >> { %v1603_v8 = vsub.f32 %v1587_v57, %v1597_v7 }
 0xa9c   : >> { %v1600_v9 = vpop.xlane.xlu1 %1599 }
 0xa9d   : >> { %v1609_v10 = vmul.f32 1.442695, %v1603_v8  ;;  %v1604_v11 = vsub.f32 %v1588_v0, %v1600_v9 }
 0xa9e   : >> { %v1591_v13 = vpop.xlane.xlu0 %1590 }
 0xa9f   : >> { %3411 = vpow2.f32 %v1609_v10  ;;  %v1611_v14 = vmul.f32 1.442695, %v1604_v11  ;;  %v1601_v15 = vsub.f32 %v1585_v63, %v1591_v13  ;;  %v1725_v10 = vsub.s32 3, %v3887_v43 }
 0xaa0   : >> { %v1594_v16 = vpop.xlane.xlu1 %1593 }
 0xaa1   : >> { %3413 = vpow2.f32 %v1611_v14  ;;  %v1605_v17 = vmul.f32 1.442695, %v1601_v15  ;;  %v1602_v18 = vsub.f32 %v1586_v3, %v1594_v16  ;;  %v3361_v3 = vld [vmem:[%s3843_s26 + $0x30] sm:$0xff]   ;;  %v1793_v15 = vrot.slane %v3905_v1, %v1725_v10  ;;  %s3585_s26 = smov 16  }
 0xaa3   : >> { %3415 = vpow2.f32 %v1605_v17  ;;  %v1607_v19 = vmul.f32 1.442695, %v1602_v18 }
 0xaa5   : >> { %3417 = vpow2.f32 %v1607_v19  ;;  %v1726_v19 = vrot.slane %v3896_v45, %v1725_v10 }
 0xaa9   : >> { %v3412_v20 = vpop.eup %3411 }
 0xaaa   : >> { %v1619_v21 = vsel %vm714_vm4, %v3412_v20, 0.0 }
 0xaab   : >> { %v3414_v22 = vpop.eup %3413  ;;  %1620 = vadd.xlane.f32.xlu0 %v1619_v21 }
 0xaac   : >> { %v1622_v23 = vsel %vm714_vm4, %v3414_v22, 0.0 }
 0xaad   : >> { %v3416_v24 = vpop.eup %3415  ;;  %1623 = vadd.xlane.f32.xlu1 %v1622_v23 }
 0xaae   : >> { %v1613_v25 = vsel %vm714_vm4, %v3416_v24, 0.0 }
 0xaaf   : >> { %v3418_v26 = vpop.eup %3417  ;;  %1614 = vadd.xlane.f32.xlu0 %v1613_v25 }
 0xab0   : >> { %v1616_v27 = vsel %vm714_vm4, %v3418_v26, 0.0 }
 0xab1   : >> { %1617 = vadd.xlane.f32.xlu1 %v1616_v27 }
 0xb38   : >> { %v1621_v38 = vpop.xlane.xlu0 %1620 }
 0xb39   : >> { %3419 = vrcp.f32 %v1621_v38 }
 0xb3a   : >> { %v1624_v40 = vpop.xlane.xlu1 %1623 }
 0xb3b   : >> { %3421 = vrcp.f32 %v1624_v40 }
 0xb3c   : >> { %v1615_v47 = vpop.xlane.xlu0 %1614 }
 0xb3d   : >> { %3423 = vrcp.f32 %v1615_v47 }
 0xb3e   : >> { %v1618_v50 = vpop.xlane.xlu1 %1617 }
 0xb3f   : >> { %3425 = vrcp.f32 %v1618_v50 }
 0xb43   : >> { %v3420_v52 = vpop.eup %3419 }
 0xb44   : >> { %v1631_v56 = vmul.f32 %v3420_v52, %v3412_v20 }
 0xb45   : >> { %v3422_v53 = vpop.eup %3421 }
 0xb46   : >> { %v1632_v57 = vmul.f32 %v3422_v53, %v3414_v22 }
 0xb47   : >> { %v3424_v58 = vpop.eup %3423 }
 0xb48   : >> { %v1634_v59 = vpack.c.bf16 %v1632_v57, %v1631_v56  ;;  %v1629_v62 = vmul.f32 %v3424_v58, %v3416_v24  ;;  %v1860_v56 = vrot.slane %v3898_v46, %v1725_v10 }
 0xb49   : >> { %v3426_v61 = vpop.eup %3425 }
 0xb4a   : >> { %v1630_v63 = vmul.f32 %v3426_v61, %v3418_v26  ;;  %3123 = vmatmul.mubr.msk.bf16.vlgmr.msra.gmra.mrb[36].mxu0 %vm714_vm4, %v1634_v59 }
 0xb4b   : >> { %3135 = vmatpush3.bf16.msra.mxu0 %v3357_v29  ;;  %3138 = vmatprep.mubr.msk.bf16.mxu0 %vm260_vm1, %v3863_v33 }
 0xb4c   : >> { %v1633_v0 = vpack.c.bf16 %v1630_v63, %v1629_v62  ;;  %3136 = vmatprep.subr.bf16.mxu0 %v3359_v60 }
 0xb4e   : >> { %3117 = vmatmul.mubr.msk.bf16.vlgmr.msra.gmra.mrb[40].mxu1 %vm714_vm4, %v1633_v0 }
 0xb4f   : >> { %3127 = vmatpush3.bf16.msra.mxu1 %v3358_v32  ;;  %3130 = vmatprep.mubr.msk.bf16.mxu1 %vm260_vm1, %v3863_v33 }
 0xb50   : >> { %3137 = vmatpush3.bf16.msra.mxu0 %v3359_v60  ;;  %3128 = vmatprep.subr.bf16.mxu1 %v3360_v2 }
 0xb51   : >> { %3150 = vmatprep.subr.bf16.mxu0 %v3582_v41 }
 0xb53   : >> { %3139 = vmatmul.mubr.msk.bf16.vlgmr.msra.gmra.mrb[40].mxu0 %vm260_vm1, %v3869_v39  ;;  %3129 = vmatpush3.bf16.msra.mxu1 %v3360_v2 }
 0xb54   : >> { %3142 = vmatprep.subr.bf16.mxu1 %v3361_v3  ;;  %3152 = vmatprep.mubr.msk.bf16.mxu0 %vm3583_vm2, %v3582_v41 }
 0xb56   : >> { %3131 = vmatmul.mubr.msk.bf16.vlgmr.msra.gmra.mrb[44].mxu1 %vm260_vm1, %v3869_v39 }
 0xb57   : >> { %3143 = vmatpush3.bf16.msra.mxu1 %v3361_v3  ;;  %3146 = vmatprep.mubr.msk.bf16.mxu1 %vm260_vm1, %v3863_v33 }
 0xb58   : >> { %3144 = vmatprep.subr.bf16.mxu1 %v3362_v4 }
 0xb5b   : >> { %3145 = vmatpush3.bf16.msra.mxu1 %v3362_v4 }
 0xb5c   : >> { %3156 = vmatprep.subr.bf16.mxu1 %v3582_v41 }
 0xb5e   : >> { %3147 = vmatmul.mubr.msk.bf16.vlgmr.msra.gmra.mrb[48].mxu1 %vm260_vm1, %v3869_v39 }
 0xb5f   : >> { %3158 = vmatprep.mubr.msk.bf16.mxu1 %vm3583_vm2, %v3582_v41 }
 0xc1d   : >> { %v4080_v5 = vpop.f32.mrb[36].mxu0 }
 0xc1e   : >> { %v3124_v6 = vpop.f32.mrb[37].mxu0 }
 0xc1f   : >> { %v4082_v7 = vpop.f32.mrb[38].mxu0 }
 0xc20   : >> { %v3324_v8 = vpack.i.bf16 %v4082_v7, %v4080_v5  ;;  %v3125_v9 = vpop.f32.mrb[39].mxu0 }
 0xc21   : >> { %v4086_v33 = vpop.f32.mrb[40].mxu1 }
 0xc22   : >> { %v3118_v11 = vpop.f32.mrb[41].mxu1 }
 0xc23   : >> { %v4089_v13 = vpop.f32.mrb[42].mxu1 }
 0xc24   : >> { %v3319_v39 = vpack.i.bf16 %v4089_v13, %v4086_v33  ;;  %v3119_v14 = vpop.f32.mrb[43].mxu1 }
 0xc26   : >> { %v3140_v16 = vpop.f32.mrb[40].mxu0 }
 0xc27   : >> { %v1840_v17 = vpop.f32.mrb[41].mxu0  ;;  %v1849_v20 = vadd.f32 %v3140_v16, %v1793_v15 }
 0xc28   : >> { %v3141_v18 = vpop.f32.mrb[42].mxu0  ;;  %v1841_v24 = vadd.f32 %v1840_v17, %v1793_v15 }
 0xc29   : >> { %v1852_v21 = vadd.f32 %v3141_v18, %v1793_v15  ;;  %v1843_v22 = vpop.f32.mrb[43].mxu0  ;;  %v3132_v23 = vpop.f32.mrb[44].mxu1 }
 0xc2a   : >> { %v1844_v43 = vadd.f32 %v1843_v22, %v1793_v15  ;;  %v1773_v25 = vpop.f32.mrb[45].mxu1  ;;  %v1782_v32 = vadd.f32 %v3132_v23, %v1726_v19 }
 0xc2b   : >> { %v1856_v26 = vpack.c.bf16 %v1852_v21, %v1849_v20  ;;  %v3133_v27 = vpop.f32.mrb[46].mxu1  ;;  %v1774_v47 = vadd.f32 %v1773_v25, %v1726_v19 }
 0xc2c   : >> { %v1855_v29 = vpack.c.bf16 %v1844_v43, %v1841_v24  ;;  %v1785_v38 = vadd.f32 %v3133_v27, %v1726_v19  ;;  %v1776_v40 = vpop.f32.mrb[47].mxu1 }
 0xc2d   : >> { %v1777_v1 = vadd.f32 %v1776_v40, %v1726_v19  ;;  %v1975_v50 = vsel %vm605_vm3, %v1856_v26, 0 }
 0xc2e   : >> { %v1789_v52 = vpack.c.bf16 %v1785_v38, %v1782_v32  ;;  %3157 = vmatpush3.bf16.xpose.msra.mxu1 %v1975_v50  ;;  %v1928_v45 = vsel %vm605_vm3, %v1855_v29, 0 }
 0xc2f   : >> { %v1788_v53 = vpack.c.bf16 %v1777_v1, %v1774_v47  ;;  %3151 = vmatpush3.bf16.xpose.msra.mxu0 %v1928_v45  ;;  %3168 = vmatprep.subr.bf16.mxu1 %v3582_v41 }
 0xc30   : >> { %3162 = vmatprep.subr.bf16.mxu0 %v3582_v41 }
 0xc31   : >> { %v3148_v57 = vpop.f32.mrb[48].mxu1 }
 0xc32   : >> { %v1907_v58 = vpop.f32.mrb[49].mxu1  ;;  %v1916_v60 = vadd.f32 %v3148_v57, %v1860_v56 }
 0xc33   : >> { %v3149_v59 = vpop.f32.mrb[50].mxu1  ;;  %v1908_v63 = vadd.f32 %v1907_v58, %v1860_v56 }
 0xc34   : >> { %v1919_v61 = vadd.f32 %v3149_v59, %v1860_v56  ;;  %v1910_v62 = vpop.f32.mrb[51].mxu1 }
 0xc35   : >> { %v1911_v0 = vadd.f32 %v1910_v62, %v1860_v56  ;;  %3159 = vmatmul.mubr.msk.bf16.vlgmr.msra.gmra.mrb[52].mxu1 %vm605_vm3, %v1789_v52 }
 0xc36   : >> { %v1923_v2 = vpack.c.bf16 %v1919_v61, %v1916_v60  ;;  %3153 = vmatmul.mubr.msk.bf16.vlgmr.msra.gmra.mrb[44].mxu0 %vm605_vm3, %v1788_v53  ;;  %3170 = vmatprep.mubr.msk.bf16.mxu1 %vm3583_vm2, %v3582_v41 }
 0xc37   : >> { %v1922_v3 = vpack.c.bf16 %v1911_v0, %v1908_v63  ;;  %3164 = vmatprep.mubr.msk.bf16.mxu0 %vm3583_vm2, %v3582_v41 }
 0xc38   : >> { %3169 = vmatpush3.bf16.msra.mxu1 %v1923_v2 }
 0xc39   : >> { %3163 = vmatpush3.bf16.msra.mxu0 %v1922_v3 }
 0xd08   : >> { %v2011_v46 = vpop.f32.mrb[52].mxu1 }
 0xd09   : >> { %v1964_v4 = vpop.f32.mrb[44].mxu0  ;;  %v3160_v6 = vpop.f32.mrb[53].mxu1  ;;  %v2020_v9 = vmul.f32 0.35355338, %v2011_v46  ;;  %v3364_v46 = vld [vmem:[%s2224_s4 + $0x8] sm:$0xff]  }
 0xd0a   : >> { %v2018_v10 = vmul.f32 0.35355338, %v1964_v4  ;;  %v3154_v11 = vpop.f32.mrb[45].mxu0  ;;  %v2014_v14 = vpop.f32.mrb[54].mxu1 }
 0xd0b   : >> { %v1967_v15 = vpop.f32.mrb[46].mxu0  ;;  %v3161_v16 = vpop.f32.mrb[55].mxu1  ;;  %v2021_v18 = vmul.f32 0.35355338, %v2014_v14  ;;  %v2024_v21 = vadd.f32 %v3759_v12, %v2020_v9 }
 0xd0c   : >> { %v2022_v17 = vadd.f32 %v3759_v12, %v2018_v10  ;;  %v2019_v19 = vmul.f32 0.35355338, %v1967_v15  ;;  %v3155_v20 = vpop.f32.mrb[47].mxu0 }
 0xd0d   : >> { %v2025_v23 = vadd.f32 %v3759_v12, %v2021_v18  ;;  %v2032_v43 = vsel %vm714_vm4, %v2024_v21, -inf }
 0xd0e   : >> { %v2023_v41 = vadd.f32 %v3759_v12, %v2019_v19  ;;  %v2026_v22 = vsel %vm714_vm4, %v2022_v17, -inf }
 0xd0f   : >> { %2027 = vmax.xlane.f32.xlu0 %v2026_v22  ;;  %v2035_v25 = vsel %vm714_vm4, %v2025_v23, -inf }
 0xd10   : >> { %v2029_v24 = vsel %vm714_vm4, %v2023_v41, -inf }
 0xd11   : >> { %2030 = vmax.xlane.f32.xlu1 %v2029_v24 }
 0xd13   : >> { %2033 = vmax.xlane.f32.xlu0 %v2032_v43 }
 0xd15   : >> { %2036 = vmax.xlane.f32.xlu1 %v2035_v25 }
 0xd9c   : >> { %v2028_v26 = vpop.xlane.xlu0 %2027 }
 0xd9d   : >> { %v2038_v27 = vsub.f32 %v2022_v17, %v2028_v26 }
 0xd9e   : >> { %v2031_v29 = vpop.xlane.xlu1 %2030 }
 0xd9f   : >> { %v2042_v32 = vmul.f32 1.442695, %v2038_v27  ;;  %v2039_v38 = vsub.f32 %v2023_v41, %v2031_v29 }
 0xda0   : >> { %v2034_v40 = vpop.xlane.xlu0 %2033 }
 0xda1   : >> { %3427 = vpow2.f32 %v2042_v32  ;;  %v2044_v47 = vmul.f32 1.442695, %v2039_v38  ;;  %v2040_v1 = vsub.f32 %v2024_v21, %v2034_v40 }
 0xda2   : >> { %v2037_v50 = vpop.xlane.xlu1 %2036 }
 0xda3   : >> { %3429 = vpow2.f32 %v2044_v47  ;;  %v2046_v52 = vmul.f32 1.442695, %v2040_v1  ;;  %v2041_v45 = vsub.f32 %v2025_v23, %v2037_v50 }
 0xda5   : >> { %3431 = vpow2.f32 %v2046_v52  ;;  %v2048_v53 = vmul.f32 1.442695, %v2041_v45 }
 0xda7   : >> { %3433 = vpow2.f32 %v2048_v53 }
 0xdab   : >> { %v3428_v56 = vpop.eup %3427 }
 0xdac   : >> { %v2050_v57 = vsel %vm714_vm4, %v3428_v56, 0.0 }
 0xdad   : >> { %v3430_v58 = vpop.eup %3429  ;;  %2051 = vadd.xlane.f32.xlu0 %v2050_v57 }
 0xdae   : >> { %v2053_v59 = vsel %vm714_vm4, %v3430_v58, 0.0 }
 0xdaf   : >> { %v3432_v60 = vpop.eup %3431  ;;  %2054 = vadd.xlane.f32.xlu1 %v2053_v59 }
 0xdb0   : >> { %v2056_v61 = vsel %vm714_vm4, %v3432_v60, 0.0 }
 0xdb1   : >> { %v3434_v62 = vpop.eup %3433  ;;  %2057 = vadd.xlane.f32.xlu0 %v2056_v61 }
 0xdb2   : >> { %v2059_v63 = vsel %vm714_vm4, %v3434_v62, 0.0 }
 0xdb3   : >> { %2060 = vadd.xlane.f32.xlu1 %v2059_v63 }
 0xdc4   : >> { %3315 = vrot.lane.b32.xlu1 %v3314_v49, %s3584_s30 }
 0xdc7   : >> { %3310 = vrot.lane.b32.xlu0 %v3309_v55, %s3584_s30  ;;  %s2863_s30 = sshll.u32 %s3579_s0, 5 }
 0xdc8   : >> { %3320 = vrot.lane.b32.xlu1 %v3319_v39, %s3585_s26  ;;  %s4197_s8 = scalar_lea.vmem %s4301_s20, %s2863_s30 }
 0xdcc   : >> { %3325 = vrot.lane.b32.xlu1 %v3324_v8, %s3585_s26  ;;  %v3363_v8 = vld [vmem:[%s2224_s4] sm:$0xff]  }
 0xdcd   : >> { %3174 = vmatprep.subr.bf16.mxu0 %v3363_v8 }
 0xe3a   : >> { %v2052_v0 = vpop.xlane.xlu0 %2051 }
 0xe3b   : >> { %3435 = vrcp.f32 %v2052_v0 }
 0xe3c   : >> { %v2055_v2 = vpop.xlane.xlu1 %2054 }
 0xe3d   : >> { %3437 = vrcp.f32 %v2055_v2 }
 0xe3e   : >> { %v2058_v3 = vpop.xlane.xlu0 %2057 }
 0xe3f   : >> { %3439 = vrcp.f32 %v2058_v3 }
 0xe40   : >> { %v2061_v44 = vpop.xlane.xlu1 %2060 }
 0xe41   : >> { %3441 = vrcp.f32 %v2061_v44 }
 0xe42   : >> { %v3311_v20 = vpop.permute.xlu0 %3310 }
 0xe43   : >> { %v3313_v41 = vunpack.i.h.bf16 %v3311_v20  ;;  %v3312_v22 = vunpack.i.l.bf16 %v3311_v20 }
 0xe44   : >> { %v3316_v19 = vpop.permute.xlu1 %3315 }
 0xe45   : >> { %v3436_v48 = vpop.eup %3435  ;;  %v2209_v25 = vsel %vm605_vm3, %v3963_v42, %v3313_v41  ;;  %v2208_v26 = vsel %vm605_vm3, %v3960_v35, %v3312_v22  ;;  %v3318_v29 = vunpack.i.h.bf16 %v3316_v19  ;;  %v3317_v32 = vunpack.i.l.bf16 %v3316_v19 }
 0xe46   : >> { %v2066_v51 = vmul.f32 %v3436_v48, %v3428_v56 }
 0xe47   : >> { %v3438_v49 = vpop.eup %3437  ;;  %v2211_v35 = vsel %vm605_vm3, %v3958_v31, %v3318_v29  ;;  %v2210_v57 = vsel %vm605_vm3, %v3956_v28, %v3317_v32  ;;  %v2832_v28 = vld [vmem:[%s2229_s6] ss:$0 sm:$0xff]  ;;  %s2310_s6 = scalar_lea.vmem %s4298_s17, %s3579_s0 }
 0xe48   : >> { %v2067_v54 = vmul.f32 %v3438_v49, %v3430_v58  ;;  %v3321_v21 = vpop.permute.xlu1 %3320 }
 0xe49   : >> { %v3440_v55 = vpop.eup %3439  ;;  %v3323_v23 = vunpack.i.h.bf16 %v3321_v21  ;;  %v3322_v24 = vunpack.i.l.bf16 %v3321_v21 }
 0xe4a   : >> { %v2070_v33 = vpack.c.bf16 %v2067_v54, %v2066_v51  ;;  %v2068_v39 = vmul.f32 %v3440_v55, %v3432_v60 }
 0xe4b   : >> { %v3442_v13 = vpop.eup %3441  ;;  %v2213_v47 = vsel %vm714_vm4, %v2209_v25, %v3323_v23  ;;  %v2212_v1 = vsel %vm714_vm4, %v2208_v26, %v3322_v24  ;;  %v3365_v24 = vld [vmem:[%s2387_s1] sm:$0xff]   ;;  %v3368_v26 = vld [vmem:[%s4197_s8 + $0x8] sm:$0xff]  }
 0xe4c   : >> { %v2069_v5 = vmul.f32 %v3442_v13, %v3434_v62  ;;  %3165 = vmatmul.mubr.msk.bf16.vlgmr.msra.gmra.mrb[48].mxu0 %vm714_vm4, %v2070_v33  ;;  %v3326_v43 = vpop.permute.xlu1 %3325  ;;  %3182 = vmatprep.subr.bf16.mxu1 %v3365_v24  ;;  %v3367_v25 = vld [vmem:[%s4197_s8] sm:$0xff]  }
 0xe4d   : >> { %3175 = vmatpush3.bf16.msra.mxu0 %v3363_v8  ;;  %v3328_v50 = vunpack.i.h.bf16 %v3326_v43  ;;  %v3327_v52 = vunpack.i.l.bf16 %v3326_v43  ;;  %v3366_v43 = vld [vmem:[%s2387_s1 + $0x8] sm:$0xff]   ;;  %s2392_s1 = scalar_lea.vmem %s4300_s19, %s3579_s0 }
 0xe4e   : >> { %v2071_v7 = vpack.c.bf16 %v2069_v5, %v2068_v39  ;;  %3176 = vmatprep.subr.bf16.mxu0 %v3364_v46 }
 0xe4f   : >> { %v2214_v60 = vsel %vm714_vm4, %v2210_v57, %v3327_v52  ;;  %v2215_v61 = vsel %vm714_vm4, %v2211_v35, %v3328_v50 }
 0xe50   : >> { %3171 = vmatmul.mubr.msk.bf16.vlgmr.msra.gmra.mrb[56].mxu1 %vm714_vm4, %v2071_v7 }
 0xe51   : >> { %3177 = vmatpush3.bf16.msra.mxu0 %v3364_v46  ;;  %3183 = vmatpush3.bf16.msra.mxu1 %v3365_v24 }
 0xe52   : >> { %3184 = vmatprep.subr.bf16.mxu1 %v3366_v43  ;;  %3190 = vmatprep.subr.bf16.mxu0 %v3367_v25 }
 0xe55   : >> { %3185 = vmatpush3.bf16.msra.mxu1 %v3366_v43 }
 0xf1f   : >> { %v2109_v4 = vpop.f32.mrb[48].mxu0 }
 0xf20   : >> { %v3166_v6 = vpop.f32.mrb[49].mxu0 }
 0xf21   : >> { %v2112_v9 = vpop.f32.mrb[50].mxu0 }
 0xf22   : >> { %v3329_v10 = vpack.i.bf16 %v2112_v9, %v2109_v4  ;;  %v3167_v11 = vpop.f32.mrb[51].mxu0 }
 0xf23   : >> { %v2153_v14 = vpop.f32.mrb[56].mxu1 }
 0xf24   : >> { %v3172_v15 = vpop.f32.mrb[57].mxu1  ;;  %3330 = vrot.lane.b32.xlu0 %v3329_v10, %s3586_s9 }
 0xf25   : >> { %v2156_v16 = vpop.f32.mrb[58].mxu1 }
 0xf26   : >> { %v3334_v17 = vpack.i.bf16 %v2156_v16, %v2153_v14  ;;  %v3173_v18 = vpop.f32.mrb[59].mxu1 }
 0xf28   : >> { %3335 = vrot.lane.b32.xlu1 %v3334_v17, %s3586_s9  ;;  %s2308_s9 = scalar_lea.vmem %s4297_s16, %s3579_s0  ;;  %s251_s0 = sadd.s32 1, %s3579_s0  }
 0xf29   : >> { %v2837_v35 = vld [vmem:[%s2308_s9] ss:$0 sm:$0xff]  ;;  %p248_p0 = scmp.ge.s32.totalorder %s251_s0, 2  }
 0xf2a   : > { %s241_s5 = sadd.s32 (%p248_p0), 1, %s3559_s5  }
 0xf2b   : > { %p238_p1 = scmp.ge.s32.totalorder (%p248_p0), %s241_s5, 2  }
 0xf96   : >> { %v3331_v27 = vpop.permute.xlu0 %3330 }
 0xf97   : >> { %v3333_v38 = vunpack.i.h.bf16 %v3331_v27  ;;  %v3332_v40 = vunpack.i.l.bf16 %v3331_v27 }
 0xf99   : >> { %v2218_v45 = vsel %vm2216_vm5, %v2213_v47, %v3333_v38  ;;  %v2217_v42 = vsel %vm2216_vm5, %v2212_v1, %v3332_v40 }
 0xf9a   : >> { %v2221_v53 = vpack.c.bf16 %v2218_v45, %v2217_v42  ;;  %v3336_v56 = vpop.permute.xlu1 %3335 }
 0xf9b   : >> { %v3338_v58 = vunpack.i.h.bf16 %v3336_v56  ;;  %v3337_v59 = vunpack.i.l.bf16 %v3336_v56 }
 0xf9c   : >> { %3178 = vmatprep.mubr.msk.bf16.mxu0 %vm260_vm1, %v2221_v53 }
 0xf9d   : >> { %v2219_v62 = vsel %vm2216_vm5, %v2214_v60, %v3337_v59  ;;  %v2220_v63 = vsel %vm2216_vm5, %v2215_v61, %v3338_v58 }
 0xf9e   : >> { %v2222_v0 = vpack.c.bf16 %v2220_v63, %v2219_v62  ;;  %v2838_v62 = vld [vmem:[%s2310_s6] ss:$0 sm:$0xff] }
 0xfa0   : >> { %3179 = vmatmul.mubr.msk.bf16.vlgmr.msra.gmra.mrb[52].mxu0 %vm260_vm1, %v2222_v0 }
 0xfa1   : >> { %3191 = vmatpush3.bf16.msra.mxu0 %v3367_v25 }
 0xfa2   : >> { %3192 = vmatprep.subr.bf16.mxu0 %v3368_v26 }
 0xfa5   : >> { %3193 = vmatpush3.bf16.msra.mxu0 %v3368_v26 }
0x1073   : >> { %v3180_v31 = vpop.f32.mrb[52].mxu0 }
0x1074   : >> { %v2289_v2 = vpop.f32.mrb[53].mxu0  ;;  %v2298_v3 = vadd.f32 %v3180_v31, %v2832_v28 }
0x1075   : >> { %v2290_v44 = vadd.f32 %v2832_v28, %v2289_v2  ;;  %v3181_v48 = vpop.f32.mrb[54].mxu0 }
0x1076   : >> { %v2292_v49 = vpop.f32.mrb[55].mxu0  ;;  %v4164_v55 = vadd.f32 %v3567_v30, %v2298_v3  ;;  %v2301_v33 = vadd.f32 %v3181_v48, %v2832_v28 }
0x1077   : >> { %v4161_v51 = vadd.f32 %v3575_v34, %v2290_v44  ;;  %v2293_v54 = vadd.f32 %v2832_v28, %v2292_v49 }
0x1078   : >> { %v4174_v7 = vadd.f32 %v3563_v36, %v2301_v33  ;;  %v2318_v34 = vsel %vm260_vm1, %v4164_v55, 0.0 }
0x1079   : >> { %v4167_v13 = vadd.f32 %v3571_v37, %v2293_v54  ;;  %v2312_v39 = vsel %vm260_vm1, %v4161_v51, 0.0 }
0x107a   : >> { %2313 = vadd.xlane.f32.xlu0 %v2312_v39  ;;  %v2321_v30 = vsel %vm260_vm1, %v4174_v7, 0.0 }
0x107b   : >> { %v2315_v5 = vsel %vm260_vm1, %v4167_v13, 0.0 }
0x107c   : >> { %2316 = vadd.xlane.f32.xlu1 %v2315_v5  ;;  %v3369_v5 = vld [vmem:[%s4197_s8 + $0x10] sm:$0xff]  }
0x107d   : >> { %3194 = vmatprep.subr.bf16.mxu0 %v3369_v5 }
0x107e   : >> { %2319 = vadd.xlane.f32.xlu0 %v2318_v34  ;;  %3195 = vmatpush3.bf16.msra.mxu0 %v3369_v5  ;;  %v3370_v34 = vld [vmem:[%s4197_s8 + $0x18] sm:$0xff]  }
0x107f   : >> { %3196 = vmatprep.subr.bf16.mxu0 %v3370_v34 }
0x1082   : >> { %2322 = vadd.xlane.f32.xlu0 %v2321_v30  ;;  %3197 = vmatpush3.bf16.msra.mxu0 %v3370_v34  ;;  %v2840_v30 = vld [vmem:[%s2392_s1] ss:$0 sm:$0xff] }
0x1107   : >> { %v2314_v37 = vpop.xlane.xlu0 %2313 }
0x1108   : >> { %v2324_v8 = vmul.f32 0.03125, %v2314_v37 }
0x1109   : >> { %v2317_v46 = vpop.xlane.xlu1 %2316 }
0x110a   : >> { %v2328_v4 = vsub.f32 %v4161_v51, %v2324_v8  ;;  %v2325_v6 = vmul.f32 0.03125, %v2317_v46 }
0x110b   : >> { %v2320_v9 = vpop.xlane.xlu0 %2319 }
0x110c   : >> { %v2329_v10 = vsub.f32 %v4167_v13, %v2325_v6  ;;  %v2326_v11 = vmul.f32 0.03125, %v2320_v9  ;;  %v2332_v36 = vmul.f32 %v2328_v4, %v2328_v4 }
0x110e   : >> { %v2330_v14 = vsub.f32 %v4164_v55, %v2326_v11  ;;  %v2336_v15 = vsel %vm260_vm1, %v2332_v36, 0.0  ;;  %v2333_v16 = vmul.f32 %v2329_v10, %v2329_v10 }
0x110f   : >> { %2337 = vadd.xlane.f32.xlu0 %v2336_v15  ;;  %v2323_v17 = vpop.xlane.xlu0 %2322 }
0x1110   : >> { %v2327_v18 = vmul.f32 0.03125, %v2323_v17  ;;  %v2339_v19 = vsel %vm260_vm1, %v2333_v16, 0.0  ;;  %v2334_v20 = vmul.f32 %v2330_v14, %v2330_v14 }
0x1111   : >> { %2340 = vadd.xlane.f32.xlu1 %v2339_v19  ;;  %v2847_v19 = vld [vmem:[%s2484_s3] ss:$0 sm:$0xff] }
0x1112   : >> { %v2331_v21 = vsub.f32 %v4174_v7, %v2327_v18  ;;  %v2342_v41 = vsel %vm260_vm1, %v2334_v20, 0.0 }
0x1113   : >> { %2343 = vadd.xlane.f32.xlu0 %v2342_v41 }
0x1114   : >> { %v2335_v22 = vmul.f32 %v2331_v21, %v2331_v21 }
0x1116   : >> { %v2345_v23 = vsel %vm260_vm1, %v2335_v22, 0.0 }
0x1117   : >> { %2346 = vadd.xlane.f32.xlu1 %v2345_v23 }
0x119c   : >> { %v2338_v27 = vpop.xlane.xlu0 %2337 }
0x119d   : >> { %v2348_v29 = vmul.f32 0.03125, %v2338_v27 }
0x119e   : >> { %v2341_v32 = vpop.xlane.xlu1 %2340 }
0x119f   : >> { %v2352_v38 = vadd.f32 1e-05, %v2348_v29  ;;  %v2349_v40 = vmul.f32 0.03125, %v2341_v32 }
0x11a0   : >> { %v2344_v47 = vpop.xlane.xlu0 %2343 }
0x11a1   : >> { %3443 = vrsqrt.f32 %v2352_v38  ;;  %v2353_v1 = vadd.f32 1e-05, %v2349_v40  ;;  %v2350_v50 = vmul.f32 0.03125, %v2344_v47 }
0x11a3   : >> { %3445 = vrsqrt.f32 %v2353_v1  ;;  %v2354_v52 = vadd.f32 1e-05, %v2350_v50 }
0x11a4   : >> { %v2347_v45 = vpop.xlane.xlu1 %2346 }
0x11a5   : >> { %3447 = vrsqrt.f32 %v2354_v52  ;;  %v2351_v42 = vmul.f32 0.03125, %v2347_v45 }
0x11a7   : >> { %v2355_v53 = vadd.f32 1e-05, %v2351_v42 }
0x11a9   : >> { %3449 = vrsqrt.f32 %v2355_v53 }
0x11ab   : >> { %v3444_v56 = vpop.eup %3443 }
0x11ac   : >> { %v2360_v57 = vmul.f32 %v3444_v56, %v2328_v4 }
0x11ad   : >> { %v3446_v58 = vpop.eup %3445 }
0x11ae   : >> { %v2361_v59 = vmul.f32 %v3446_v58, %v2329_v10  ;;  %v2370_v60 = vmul.f32 %v2837_v35, %v2360_v57 }
0x11af   : >> { %v3448_v61 = vpop.eup %3447 }
0x11b0   : >> { %v2362_v63 = vmul.f32 %v3448_v61, %v2330_v14  ;;  %v2371_v0 = vmul.f32 %v2837_v35, %v2361_v59  ;;  %v2380_v28 = vadd.f32 %v2838_v62, %v2370_v60 }
0x11b2   : >> { %v2381_v31 = vadd.f32 %v2838_v62, %v2371_v0  ;;  %v2372_v3 = vmul.f32 %v2837_v35, %v2362_v63 }
0x11b3   : >> { %v3450_v2 = vpop.eup %3449 }
0x11b4   : >> { %v2363_v44 = vmul.f32 %v3450_v2, %v2331_v21  ;;  %v2384_v48 = vpack.c.bf16 %v2381_v31, %v2380_v28  ;;  %v2382_v54 = vadd.f32 %v2838_v62, %v2372_v3 }
0x11b6   : >> { %v2373_v49 = vmul.f32 %v2837_v35, %v2363_v44  ;;  %3186 = vmatprep.mubr.msk.bf16.mxu1 %vm260_vm1, %v2384_v48 }
0x11b8   : >> { %v2383_v33 = vadd.f32 %v2838_v62, %v2373_v49 }
0x11ba   : >> { %v2385_v39 = vpack.c.bf16 %v2383_v33, %v2382_v54 }
0x11bc   : >> { %3187 = vmatmul.mubr.msk.bf16.vlgmr.msra.gmra.mrb[60].mxu1 %vm260_vm1, %v2385_v39 }
0x128f   : >> { %v3188_v37 = vpop.f32.mrb[60].mxu1 }
0x1290   : >> { %v2461_v8 = vadd.f32 %v3188_v37, %v2840_v30  ;;  %v2452_v46 = vpop.f32.mrb[61].mxu1 }
0x1291   : >> { %v2453_v4 = vadd.f32 %v2840_v30, %v2452_v46  ;;  %v3189_v6 = vpop.f32.mrb[62].mxu1 }
0x1292   : >> { %v2464_v9 = vadd.f32 %v3189_v6, %v2840_v30  ;;  %v2455_v10 = vpop.f32.mrb[63].mxu1  ;;  %v2469_v36 = vmax.f32 %v2461_v8, 0.0 }
0x1293   : >> { %v2456_v11 = vadd.f32 %v2840_v30, %v2455_v10  ;;  %v2467_v15 = vmax.f32 %v2453_v4, 0.0 }
0x1294   : >> { %v2470_v14 = vmax.f32 %v2464_v9, 0.0 }
0x1295   : >> { %v2468_v16 = vmax.f32 %v2456_v11, 0.0 }
0x1296   : >> { %v2472_v17 = vpack.c.bf16 %v2470_v14, %v2469_v36 }
0x1297   : >> { %v2471_v18 = vpack.c.bf16 %v2468_v16, %v2467_v15 }
0x1299   : >> { %3198 = vmatprep.mubr.msk.bf16.mxu0 %vm2516_vm6, %v2471_v18 }
0x129a   : >> { %3199 = vmatmul.mubr.msk.bf16.vlgmr.msra.gmra.mrb[56].mxu0 %vm2516_vm6, %v2472_v17 }
0x136d   : >> { %v3200_v20 = vpop.f32.mrb[56].mxu0 }
0x136e   : >> { %v2566_v21 = vadd.f32 %v3200_v20, %v2847_v19  ;;  %v2557_v41 = vpop.f32.mrb[57].mxu0 }
0x136f   : >> { %v2558_v22 = vadd.f32 %v2847_v19, %v2557_v41  ;;  %v3201_v23 = vpop.f32.mrb[58].mxu0  ;;  %250 = sbr.rel (!%p248_p0) target bundleno = 260 (0x104), region = 154 }
0x1370   : >> { %v2574_v24 = vadd.f32 %v2566_v21, %v4164_v55   ;;  %v2569_v43 = vadd.f32 %v3201_v23, %v2847_v19  ;;  %v2560_v25 = vpop.f32.mrb[59].mxu0 }
0x1371   : >> { %v2572_v26 = vadd.f32 %v2558_v22, %v4161_v51   ;;  %v2561_v27 = vadd.f32 %v2847_v19, %v2560_v25 }
0x1372   : >> { %v2575_v29 = vadd.f32 %v2569_v43, %v4174_v7   ;;  %v4332_v30 = vmov %v2574_v24 }
0x1373   : >> { %v2573_v32 = vadd.f32 %v2561_v27, %v4167_v13   ;;  %v4334_v34 = vmov %v2572_v26  ;;  %v4336_v30 = vmov (%p248_p0), %v2574_v24 }
0x1374   : >> { %v4331_v36 = vmov %v2575_v29  ;;  %v4338_v34 = vmov (%p248_p0), %v2572_v26 }
0x1375   : >> { %v4333_v37 = vmov %v2573_v32  ;;  %v4335_v36 = vmov (%p248_p0), %v2575_v29 }
0x1376   : > { %v4337_v37 = vmov %v2573_v32  ;;  %240 = sbr.rel (!%p238_p1) target bundleno = 259 (0x103), region = 165  ;;  %v3451_v51 = vld [vmem:[%s4303_s22] sm:$0xff] (%p238_p1)   ;;  %v2584_v55 = vpack.c.bf16 (%p238_p1), %v2572_v26, %v2572_v26  ;;  %v2585_v13 = vpack.c.bf16 (%p238_p1), %v2574_v24, %v2574_v24  ;;  %v3587_v7 = vmov (%p238_p1), 0.0   ;;  %v3452_v38 = vld [vmem:[%s4303_s22 + $0x8] sm:$0xff] (%p238_p1)   ;;  %s3589_s10 = smov (%p238_p1), [#allocation2]  }
0x1377   :  { %3202 = vmatprep.subr.bf16.mxu0 (%p238_p1), %v3587_v7  ;;  %vm3588_vm7 = vmmov (%p238_p1), 0   ;;  %vm2579_vm8 = vcmask (%p238_p1), 1041409   ;;  %v2578_v52 = vrot.slane (%p238_p1), %v2574_v24, 7  ;;  %vm2582_vm9 = vcmask (%p238_p1), 254976   ;;  %s2668_s11 = sshll.u32 (%p238_p1), %s3589_s10, 4  ;;  %s2669_s11 = int_to_ptr.vmem [resolvable:$true] %s2668_s11 }
0x1378   :  { %3203 = vmatpush3.bf16.msra.mxu0 (%p238_p1), %v3451_v51  ;;  %3206 = vmatprep.mubr.msk.bf16.mxu0 (%p238_p1), %vm3588_vm7, %v3587_v7  ;;  %v2599_v40 = vunpack.c.l.b16 (%p238_p1), %v2584_v55  ;;  %v2600_v47 = vunpack.c.l.b16 (%p238_p1), %v2585_v13  ;;  %s3453_s12 = scalar_lea.vmem (%p238_p1), %s2669_s11, 32  ;;  %p3458_p3 = scmp.lt.s32.totalorder (%p238_p1), %s2669_s11, %s2669_s11 }
0x1379   :  { %3204 = vmatprep.subr.bf16.mxu0 (%p238_p1), %v3587_v7  ;;  %v2580_v45 = vsel (%p238_p1), %vm2579_vm8, %v2578_v52, %v2572_v26  ;;  %p3454_p2 = scmp.ne.s32.totalorder (%p238_p1), %s2669_s11, %s3453_s12  ;;  %p3459_p4 = scmp.lt.s32.totalorder (%p238_p1), %s3453_s12, %s3453_s12 }
0x137a   :  { %v2601_v1 = vrot.slane (%p238_p1), %v2600_v47, 7  ;;  %2583 = vst.msk [vmem:[#allocation2] sm:$0x3] (%p238_p1), %vm2582_vm9, %v2580_v45 }
0x137b   :  { %p3460_p5 = por (%p238_p1), %p3459_p4, %p3458_p3 }
0x137c   :  { %3205 = vmatpush3.bf16.msra.mxu0 (%p238_p1), %v3452_v38  ;;  %v2602_v12 = vsel (%p238_p1), %vm2579_vm8, %v2601_v1, %v2599_v40 }
0x137d   :  { %v2603_v50 = vpack.c.b16 %v2602_v12, %v2602_v12  ;;  %p3461_p6 = pnand %p3460_p5, %p3454_p2 }
0x137f   :  { %3207 = vmatmul.mubr.msk.bf16.vlgmr.msra.gmra.mrb[0].mxu0 %vm260_vm1, %v2603_v50 }
0x1380   :  { %3464 = shalt.err (!%p3461_p6)
}
0x1381   :  { %s3465_s15 = scalar_lea.hbm %s4305_s24, 32 }
0x1382   :  { %p3466_p7 = scmp.ne.s32.totalorder %s4305_s24, %s3465_s15  ;;  %p3469_p8 = scmp.lt.u32.totalorder %s3465_s15, %s4305_s24 }
0x1384   :  { %p3471_p9 = pnand %p3469_p8, %p3466_p7 }
0x1386   :  { %3474 = shalt.err (!%p3471_p9)
}
0x1387   :  { %2671 = dma.vmem_to_hbm [thread:$0]  %s2669_s11, 32, %s4305_s24, [#allocation3]   ;;  %v2854_v42 = vld [vmem:[%s4304_s23] ss:$0 sm:$0xff]  ;;  %vm2660_vm10 = vcmask 58368  }
0x1388   :  { %s3590_s9 = smov [#allocation4]  }
0x1389   :  { %s2678_s29 = sshll.u32 %s3590_s9, 4  ;;  %s2679_s29 = int_to_ptr.vmem [resolvable:$true] %s2678_s29 }
0x138a   :  { %s3475_s2 = scalar_lea.vmem %s2679_s29, 32  ;;  %p3480_p11 = scmp.lt.s32.totalorder %s2679_s29, %s2679_s29 }
0x138b   :  { %p3476_p10 = scmp.ne.s32.totalorder %s2679_s29, %s3475_s2  ;;  %p3481_p12 = scmp.lt.s32.totalorder %s3475_s2, %s3475_s2 }
0x138d   :  { %p3482_p13 = por %p3481_p12, %p3480_p11 }
0x138f   :  { %p3483_p0 = pnand %p3482_p13, %p3476_p10 }
0x1452   :  { %v2654_v53 = vpop.f32.mrb[0].mxu0 }
0x1453   :  { %v2655_v56 = vadd.f32 %v2854_v42, %v2654_v53  ;;  %v3208_v35 = vpop.f32.mrb[1].mxu0 }
0x1454   :  { %v2657_v57 = vpop.f32.mrb[2].mxu0 }
0x1455   :  { %v3209_v58 = vpop.f32.mrb[3].mxu0  ;;  %2661 = vst.msk [vmem:[#allocation4] sm:$0x3] %vm2660_vm10, %v2655_v56 }
0x1456   :  { %3486 = shalt.err (!%p3483_p0)
}
0x1457   :  { %s3487_s23 = scalar_lea.hbm %s4306_s25, 32 }
0x1458   :  { %p3488_p1 = scmp.ne.s32.totalorder %s4306_s25, %s3487_s23  ;;  %p3491_p2 = scmp.lt.u32.totalorder %s3487_s23, %s4306_s25 }
0x145a   :  { %p3493_p3 = pnand %p3491_p2, %p3488_p1 }
0x145c   :  { %3496 = shalt.err (!%p3493_p3)
}
0x145d   :  { %2681 = dma.vmem_to_hbm [thread:$0]  %s2679_s29, 32, %s4306_s25, [#allocation5]  }
0x145e   :  { %3537 = dma.done.wait [#allocation3], 32  }
0x145f   :  { %3538 = vsyncadd [#allocation3], 4294967264 }
0x1460   :  { %3539 = dma.done.wait [#allocation5], 32  }
0x1461   :  { %3540 = vsyncadd [#allocation5], 4294967264 }
0x1462   :  { %2688 = vsyncpa [#allocation3], 1 }
0x1463   :  { %2689 = vsyncpa [#allocation5], 1 }

</bundles_post_ra>
